<compile_context>
chip_gen: v7x
topology: tpu7x:2x2x1
jax: 0.10.0
libtpu: 0.0.40
codegen_flags: <defaults>
</compile_context>

<pallas_src>
import functools

import jax
import jax.numpy as jnp
from jax import lax
from jax.experimental import pallas as pl
from jax.experimental.pallas import tpu as pltpu


# ----------------------------------------------------------------------------
# Pallas kernel: embedding (one-hot matmul) -> 3x (valid Conv1d + ReLU)
#                -> MaxPool1d(k=2, s=2).  One grid step == TB batch elements.
# ----------------------------------------------------------------------------
def drug_block_kernel(tok_ref, emb_ref, w1_ref, b1_ref, w2_ref, b2_ref,
                      w3_ref, b3_ref, o_ref, *, tb, seq_len, k_taps):
    vocab, _ = emb_ref.shape

    # ---- Embedding as a one-hot MXU matmul over the whole batch tile -------
    tok = tok_ref[...]                                             # (TB*L, 1) i32
    lane_ids = lax.broadcasted_iota(jnp.int32, (tb * seq_len, vocab), 1)
    onehot = (tok == lane_ids).astype(jnp.float32)                 # (TB*L, V)
    x_all = jnp.dot(onehot, emb_ref[...],
                    preferred_element_type=jnp.float32)            # (TB*L, E)

    # Hoist weight / bias loads out of the (unrolled) batch loop.
    w1, b1 = w1_ref[...], b1_ref[...]
    w2, b2 = w2_ref[...], b2_ref[...]
    w3, b3 = w3_ref[...], b3_ref[...]

    def conv_relu(inp, w_flat, bias):
        # inp: (L_in, C_in); w_flat: (K*C_in, C_out) pre-flattened im2col weights.
        l_out = inp.shape[0] - k_taps + 1
        cols = jnp.concatenate(
            [inp[k:k + l_out, :] for k in range(k_taps)], axis=-1)  # (L_out, K*C_in)
        acc = jnp.dot(cols, w_flat, preferred_element_type=jnp.float32)
        return jnp.maximum(acc + bias, 0.0)                         # bias (1, C_out)

    l_pool = o_ref.shape[1]
    pooled_tiles = []
    for t in range(tb):                    # static unroll over the batch tile
        x = x_all[t * seq_len:(t + 1) * seq_len, :]                 # (L, E)
        y = conv_relu(x, w1, b1)                                    # (L1, F)
        y = conv_relu(y, w2, b2)                                    # (L2, 2F)
        y = conv_relu(y, w3, b3)                                    # (L3, 3F)
        # MaxPool1d(kernel=2, stride=2), floor mode like torch.
        pooled = jnp.concatenate(
            [jnp.maximum(y[2 * i:2 * i + 1, :], y[2 * i + 1:2 * i + 2, :])
             for i in range(l_pool)], axis=0)                       # (Lp, 3F)
        pooled_tiles.append(pooled)

    # Single dense store of the whole (TB, Lp, 3F) output block.
    o_ref[...] = jnp.stack(pooled_tiles, axis=0)


# ----------------------------------------------------------------------------
# Wrapper
# ----------------------------------------------------------------------------
def _pick_batch_tile(batch, seq_len, max_tb):
    if batch <= max_tb:
        return batch                       # one step, block == full array (legal)
    for tb in range(max_tb, 1, -1):
        # tb must divide batch; tb*seq_len must be sublane-aligned (mult of 8).
        if batch % tb == 0 and (tb * seq_len) % 8 == 0:
            return tb
    return batch                           # fallback: one big tile (always legal)


def drug_block_forward(tokens, emb_table, w1, b1, w2, b2, w3, b3, *,
                       max_batch_tile=8):
    batch, seq_len = tokens.shape
    vocab, emb_dim = emb_table.shape
    k = w1.shape[0]
    f1, f2, f3 = w1.shape[2], w2.shape[2], w3.shape[2]
    l1 = seq_len - k + 1
    l2 = l1 - k + 1
    l3 = l2 - k + 1
    lp = l3 // 2

    tb = _pick_batch_tile(batch, seq_len, max_batch_tile)
    grid = (batch // tb,)

    # Tokens as a (B*L, 1) column so the kernel's one-hot compare is a pure
    # lane-broadcast (no in-kernel transpose of the token layout).
    tokens2d = tokens.reshape(batch * seq_len, 1).astype(jnp.int32)
    emb = emb_table.astype(jnp.float32)
    # Pre-flatten conv weights to im2col layout (K*C_in, C_out).
    w1f = w1.astype(jnp.float32).reshape(k * emb_dim, f1)
    w2f = w2.astype(jnp.float32).reshape(k * f1, f2)
    w3f = w3.astype(jnp.float32).reshape(k * f2, f3)

    kernel = functools.partial(drug_block_kernel, tb=tb, seq_len=seq_len,
                               k_taps=k)

    out = pl.pallas_call(
        kernel,
        out_shape=jax.ShapeDtypeStruct((batch, lp, f3), jnp.float32),
        grid_spec=pltpu.PrefetchScalarGridSpec(
            num_scalar_prefetch=0,
            grid=grid,
            in_specs=[
                pl.BlockSpec((tb * seq_len, 1), lambda i: (i, 0)),
                pl.BlockSpec((vocab, emb_dim), lambda i: (0, 0)),
                pl.BlockSpec(w1f.shape, lambda i: (0, 0)),
                pl.BlockSpec(b1.shape, lambda i: (0, 0)),
                pl.BlockSpec(w2f.shape, lambda i: (0, 0)),
                pl.BlockSpec(b2.shape, lambda i: (0, 0)),
                pl.BlockSpec(w3f.shape, lambda i: (0, 0)),
                pl.BlockSpec(b3.shape, lambda i: (0, 0)),
            ],
            out_specs=pl.BlockSpec((tb, lp, f3), lambda i: (i, 0, 0)),
        ),
        compiler_params=pltpu.CompilerParams(
            dimension_semantics=("parallel",)),
    )(tokens2d, emb, w1f, b1.astype(jnp.float32), w2f,
      b2.astype(jnp.float32), w3f, b3.astype(jnp.float32))

    # Back to PyTorch NCL layout: (B, 3*num_filters, L_pool)
    return jnp.transpose(out, (0, 2, 1))


# ----------------------------------------------------------------------------
# Pure-JAX reference (mirrors the PyTorch forward) for the correctness check.
# ----------------------------------------------------------------------------
def reference_forward(tokens, emb_table, w1, b1, w2, b2, w3, b3):
    x = emb_table[tokens].astype(jnp.float32)      # (B, L, E)
    x = jnp.transpose(x, (0, 2, 1))                # (B, E, L)  -- NCL

    def conv1d(x_ncl, w_kio, bias):
        # w_kio: (K, C_in, C_out) -> torch layout (C_out, C_in, K)
        w_oik = jnp.transpose(w_kio, (2, 1, 0))
        y = lax.conv_general_dilated(
            x_ncl, w_oik, window_strides=(1,), padding="VALID",
            dimension_numbers=("NCH", "OIH", "NCH"))
        return jnp.maximum(y + bias.reshape(1, -1, 1), 0.0)

    x = conv1d(x, w1, b1)
    x = conv1d(x, w2, b2)
    x = conv1d(x, w3, b3)
    B, C, L3 = x.shape
    Lp = L3 // 2
    x = x[:, :, :2 * Lp].reshape(B, C, Lp, 2).max(axis=-1)
    return x


# ----------------------------------------------------------------------------
if __name__ == "__main__":
    # Module hyper-parameters (small, consistent with the PyTorch __init__).
    drug_dict_len = 64
    embedding_size = 32
    num_filters = 8
    drug_kernel_size = 4
    batch = 2
    seq_len = 32

    key = jax.random.PRNGKey(0)
    k_emb, k_w1, k_b1, k_w2, k_b2, k_w3, k_b3, k_tok = jax.random.split(key, 8)

    def conv_init(kw, kb, c_in, c_out, k):
        bound = 1.0 / jnp.sqrt(c_in * k)
        w = jax.random.uniform(kw, (k, c_in, c_out), jnp.float32, -bound, bound)
        b = jax.random.uniform(kb, (1, c_out), jnp.float32, -bound, bound)
        return w, b

    emb_table = jax.random.normal(k_emb, (drug_dict_len, embedding_size),
                                  jnp.float32)
    w1, b1 = conv_init(k_w1, k_b1, embedding_size, num_filters,
                       drug_kernel_size)
    w2, b2 = conv_init(k_w2, k_b2, num_filters, 2 * num_filters,
                       drug_kernel_size)
    w3, b3 = conv_init(k_w3, k_b3, 2 * num_filters, 3 * num_filters,
                       drug_kernel_size)

    tokens = jax.random.randint(k_tok, (batch, seq_len), 0, drug_dict_len,
                                dtype=jnp.int32)

    fwd = jax.jit(drug_block_forward)
    out = fwd(tokens, emb_table, w1, b1, w2, b2, w3, b3)
    out = jax.block_until_ready(out)

    ref = reference_forward(tokens, emb_table, w1, b1, w2, b2, w3, b3)
    assert out.shape == ref.shape, (out.shape, ref.shape)
    assert bool(jnp.allclose(out, ref, atol=1e-2, rtol=1e-2)), "mismatch vs ref"

    print("KERNEL_OK")
</pallas_src>

<mosaic_0001>
module attributes {stable_mosaic.version = 11 : i64} {
  func.func @drug_block_kernel(%arg0: i32, %arg1: memref<64x1xi32, #tpu.memory_space<vmem>>, %arg2: memref<64x32xf32, #tpu.memory_space<vmem>>, %arg3: memref<128x8xf32, #tpu.memory_space<vmem>>, %arg4: memref<1x8xf32, #tpu.memory_space<vmem>>, %arg5: memref<32x16xf32, #tpu.memory_space<vmem>>, %arg6: memref<1x16xf32, #tpu.memory_space<vmem>>, %arg7: memref<64x24xf32, #tpu.memory_space<vmem>>, %arg8: memref<1x24xf32, #tpu.memory_space<vmem>>, %arg9: memref<2x11x24xf32, #tpu.memory_space<vmem>>) attributes {dimension_semantics = [#tpu.dimension_semantics<parallel>], iteration_bounds = array<i64: 1>, scalar_prefetch = 0 : i64, scratch_operands = 0 : i64, tpu.core_type = #tpu.core_type<tc>, window_params = [{transform_indices = @transform_0, window_bounds = array<i64: 64, 1>}, {pipeline_mode = #tpu.pipeline_mode<synchronous>, transform_indices = @transform_1, window_bounds = array<i64: 64, 32>}, {pipeline_mode = #tpu.pipeline_mode<synchronous>, transform_indices = @transform_2, window_bounds = array<i64: 128, 8>}, {pipeline_mode = #tpu.pipeline_mode<synchronous>, transform_indices = @transform_3, window_bounds = array<i64: 1, 8>}, {pipeline_mode = #tpu.pipeline_mode<synchronous>, transform_indices = @transform_4, window_bounds = array<i64: 32, 16>}, {pipeline_mode = #tpu.pipeline_mode<synchronous>, transform_indices = @transform_5, window_bounds = array<i64: 1, 16>}, {pipeline_mode = #tpu.pipeline_mode<synchronous>, transform_indices = @transform_6, window_bounds = array<i64: 64, 24>}, {pipeline_mode = #tpu.pipeline_mode<synchronous>, transform_indices = @transform_7, window_bounds = array<i64: 1, 24>}, {transform_indices = @transform_8, window_bounds = array<i64: 2, 11, 24>}]} {
    %c0 = arith.constant 0 : index
    %c0_0 = arith.constant 0 : index
    %0 = vector.load %arg1[%c0, %c0_0] : memref<64x1xi32, #tpu.memory_space<vmem>>, vector<64x1xi32>
    %1 = tpu.iota {dimensions = array<i32: 1>} : vector<64x64xi32>
    %2 = vector.broadcast %0 : vector<64x1xi32> to vector<64x64xi32>
    %3 = arith.cmpi eq, %2, %1 : vector<64x64xi32>
    %4 = arith.extui %3 : vector<64x64xi1> to vector<64x64xi32>
    %5 = arith.sitofp %4 : vector<64x64xi32> to vector<64x64xf32>
    %c0_1 = arith.constant 0 : index
    %c0_2 = arith.constant 0 : index
    %6 = vector.load %arg2[%c0_1, %c0_2] : memref<64x32xf32, #tpu.memory_space<vmem>>, vector<64x32xf32>
    %cst = arith.constant dense<0.000000e+00> : vector<64x32xf32>
    %7 = tpu.matmul %5, %6, %cst {dimension_numbers = #tpu.dot_dimension_numbers<[1], [0], [0], [1], [0, 0, 1, 1], [], []>} : vector<64x64xf32>, vector<64x32xf32>, vector<64x32xf32> -> vector<64x32xf32>
    %c0_3 = arith.constant 0 : index
    %c0_4 = arith.constant 0 : index
    %8 = vector.load %arg3[%c0_3, %c0_4] : memref<128x8xf32, #tpu.memory_space<vmem>>, vector<128x8xf32>
    %c0_5 = arith.constant 0 : index
    %c0_6 = arith.constant 0 : index
    %9 = vector.load %arg4[%c0_5, %c0_6] : memref<1x8xf32, #tpu.memory_space<vmem>>, vector<1x8xf32>
    %c0_7 = arith.constant 0 : index
    %c0_8 = arith.constant 0 : index
    %10 = vector.load %arg5[%c0_7, %c0_8] : memref<32x16xf32, #tpu.memory_space<vmem>>, vector<32x16xf32>
    %c0_9 = arith.constant 0 : index
    %c0_10 = arith.constant 0 : index
    %11 = vector.load %arg6[%c0_9, %c0_10] : memref<1x16xf32, #tpu.memory_space<vmem>>, vector<1x16xf32>
    %c0_11 = arith.constant 0 : index
    %c0_12 = arith.constant 0 : index
    %12 = vector.load %arg7[%c0_11, %c0_12] : memref<64x24xf32, #tpu.memory_space<vmem>>, vector<64x24xf32>
    %c0_13 = arith.constant 0 : index
    %c0_14 = arith.constant 0 : index
    %13 = vector.load %arg8[%c0_13, %c0_14] : memref<1x24xf32, #tpu.memory_space<vmem>>, vector<1x24xf32>
    %14 = vector.extract_strided_slice %7 {offsets = [0, 0], sizes = [32, 32], strides = [1, 1]} : vector<64x32xf32> to vector<32x32xf32>
    %15 = vector.extract_strided_slice %14 {offsets = [0, 0], sizes = [29, 32], strides = [1, 1]} : vector<32x32xf32> to vector<29x32xf32>
    %16 = vector.extract_strided_slice %14 {offsets = [1, 0], sizes = [29, 32], strides = [1, 1]} : vector<32x32xf32> to vector<29x32xf32>
    %17 = vector.extract_strided_slice %14 {offsets = [2, 0], sizes = [29, 32], strides = [1, 1]} : vector<32x32xf32> to vector<29x32xf32>
    %18 = vector.extract_strided_slice %14 {offsets = [3, 0], sizes = [29, 32], strides = [1, 1]} : vector<32x32xf32> to vector<29x32xf32>
    %19 = tpu.concatenate %15, %16, %17, %18 in 1 : vector<29x32xf32>, vector<29x32xf32>, vector<29x32xf32>, vector<29x32xf32> -> vector<29x128xf32>
    %cst_15 = arith.constant dense<0.000000e+00> : vector<29x8xf32>
    %20 = tpu.matmul %19, %8, %cst_15 {dimension_numbers = #tpu.dot_dimension_numbers<[1], [0], [0], [1], [0, 0, 1, 1], [], []>} : vector<29x128xf32>, vector<128x8xf32>, vector<29x8xf32> -> vector<29x8xf32>
    %21 = vector.broadcast %9 : vector<1x8xf32> to vector<29x8xf32>
    %22 = arith.addf %20, %21 : vector<29x8xf32>
    %cst_16 = arith.constant 0.000000e+00 : f32
    %23 = vector.broadcast %cst_16 : f32 to vector<29x8xf32>
    %24 = arith.maximumf %22, %23 : vector<29x8xf32>
    %25 = vector.extract_strided_slice %24 {offsets = [0, 0], sizes = [26, 8], strides = [1, 1]} : vector<29x8xf32> to vector<26x8xf32>
    %26 = vector.extract_strided_slice %24 {offsets = [1, 0], sizes = [26, 8], strides = [1, 1]} : vector<29x8xf32> to vector<26x8xf32>
    %27 = vector.extract_strided_slice %24 {offsets = [2, 0], sizes = [26, 8], strides = [1, 1]} : vector<29x8xf32> to vector<26x8xf32>
    %28 = vector.extract_strided_slice %24 {offsets = [3, 0], sizes = [26, 8], strides = [1, 1]} : vector<29x8xf32> to vector<26x8xf32>
    %29 = tpu.concatenate %25, %26, %27, %28 in 1 : vector<26x8xf32>, vector<26x8xf32>, vector<26x8xf32>, vector<26x8xf32> -> vector<26x32xf32>
    %cst_17 = arith.constant dense<0.000000e+00> : vector<26x16xf32>
    %30 = tpu.matmul %29, %10, %cst_17 {dimension_numbers = #tpu.dot_dimension_numbers<[1], [0], [0], [1], [0, 0, 1, 1], [], []>} : vector<26x32xf32>, vector<32x16xf32>, vector<26x16xf32> -> vector<26x16xf32>
    %31 = vector.broadcast %11 : vector<1x16xf32> to vector<26x16xf32>
    %32 = arith.addf %30, %31 : vector<26x16xf32>
    %cst_18 = arith.constant 0.000000e+00 : f32
    %33 = vector.broadcast %cst_18 : f32 to vector<26x16xf32>
    %34 = arith.maximumf %32, %33 : vector<26x16xf32>
    %35 = vector.extract_strided_slice %34 {offsets = [0, 0], sizes = [23, 16], strides = [1, 1]} : vector<26x16xf32> to vector<23x16xf32>
    %36 = vector.extract_strided_slice %34 {offsets = [1, 0], sizes = [23, 16], strides = [1, 1]} : vector<26x16xf32> to vector<23x16xf32>
    %37 = vector.extract_strided_slice %34 {offsets = [2, 0], sizes = [23, 16], strides = [1, 1]} : vector<26x16xf32> to vector<23x16xf32>
    %38 = vector.extract_strided_slice %34 {offsets = [3, 0], sizes = [23, 16], strides = [1, 1]} : vector<26x16xf32> to vector<23x16xf32>
    %39 = tpu.concatenate %35, %36, %37, %38 in 1 : vector<23x16xf32>, vector<23x16xf32>, vector<23x16xf32>, vector<23x16xf32> -> vector<23x64xf32>
    %cst_19 = arith.constant dense<0.000000e+00> : vector<23x24xf32>
    %40 = tpu.matmul %39, %12, %cst_19 {dimension_numbers = #tpu.dot_dimension_numbers<[1], [0], [0], [1], [0, 0, 1, 1], [], []>} : vector<23x64xf32>, vector<64x24xf32>, vector<23x24xf32> -> vector<23x24xf32>
    %41 = vector.broadcast %13 : vector<1x24xf32> to vector<23x24xf32>
    %42 = arith.addf %40, %41 : vector<23x24xf32>
    %cst_20 = arith.constant 0.000000e+00 : f32
    %43 = vector.broadcast %cst_20 : f32 to vector<23x24xf32>
    %44 = arith.maximumf %42, %43 : vector<23x24xf32>
    %45 = vector.extract_strided_slice %44 {offsets = [0, 0], sizes = [1, 24], strides = [1, 1]} : vector<23x24xf32> to vector<1x24xf32>
    %46 = vector.extract_strided_slice %44 {offsets = [1, 0], sizes = [1, 24], strides = [1, 1]} : vector<23x24xf32> to vector<1x24xf32>
    %47 = arith.maximumf %45, %46 : vector<1x24xf32>
    %48 = vector.extract_strided_slice %44 {offsets = [2, 0], sizes = [1, 24], strides = [1, 1]} : vector<23x24xf32> to vector<1x24xf32>
    %49 = vector.extract_strided_slice %44 {offsets = [3, 0], sizes = [1, 24], strides = [1, 1]} : vector<23x24xf32> to vector<1x24xf32>
    %50 = arith.maximumf %48, %49 : vector<1x24xf32>
    %51 = vector.extract_strided_slice %44 {offsets = [4, 0], sizes = [1, 24], strides = [1, 1]} : vector<23x24xf32> to vector<1x24xf32>
    %52 = vector.extract_strided_slice %44 {offsets = [5, 0], sizes = [1, 24], strides = [1, 1]} : vector<23x24xf32> to vector<1x24xf32>
    %53 = arith.maximumf %51, %52 : vector<1x24xf32>
    %54 = vector.extract_strided_slice %44 {offsets = [6, 0], sizes = [1, 24], strides = [1, 1]} : vector<23x24xf32> to vector<1x24xf32>
    %55 = vector.extract_strided_slice %44 {offsets = [7, 0], sizes = [1, 24], strides = [1, 1]} : vector<23x24xf32> to vector<1x24xf32>
    %56 = arith.maximumf %54, %55 : vector<1x24xf32>
    %57 = vector.extract_strided_slice %44 {offsets = [8, 0], sizes = [1, 24], strides = [1, 1]} : vector<23x24xf32> to vector<1x24xf32>
    %58 = vector.extract_strided_slice %44 {offsets = [9, 0], sizes = [1, 24], strides = [1, 1]} : vector<23x24xf32> to vector<1x24xf32>
    %59 = arith.maximumf %57, %58 : vector<1x24xf32>
    %60 = vector.extract_strided_slice %44 {offsets = [10, 0], sizes = [1, 24], strides = [1, 1]} : vector<23x24xf32> to vector<1x24xf32>
    %61 = vector.extract_strided_slice %44 {offsets = [11, 0], sizes = [1, 24], strides = [1, 1]} : vector<23x24xf32> to vector<1x24xf32>
    %62 = arith.maximumf %60, %61 : vector<1x24xf32>
    %63 = vector.extract_strided_slice %44 {offsets = [12, 0], sizes = [1, 24], strides = [1, 1]} : vector<23x24xf32> to vector<1x24xf32>
    %64 = vector.extract_strided_slice %44 {offsets = [13, 0], sizes = [1, 24], strides = [1, 1]} : vector<23x24xf32> to vector<1x24xf32>
    %65 = arith.maximumf %63, %64 : vector<1x24xf32>
    %66 = vector.extract_strided_slice %44 {offsets = [14, 0], sizes = [1, 24], strides = [1, 1]} : vector<23x24xf32> to vector<1x24xf32>
    %67 = vector.extract_strided_slice %44 {offsets = [15, 0], sizes = [1, 24], strides = [1, 1]} : vector<23x24xf32> to vector<1x24xf32>
    %68 = arith.maximumf %66, %67 : vector<1x24xf32>
    %69 = vector.extract_strided_slice %44 {offsets = [16, 0], sizes = [1, 24], strides = [1, 1]} : vector<23x24xf32> to vector<1x24xf32>
    %70 = vector.extract_strided_slice %44 {offsets = [17, 0], sizes = [1, 24], strides = [1, 1]} : vector<23x24xf32> to vector<1x24xf32>
    %71 = arith.maximumf %69, %70 : vector<1x24xf32>
    %72 = vector.extract_strided_slice %44 {offsets = [18, 0], sizes = [1, 24], strides = [1, 1]} : vector<23x24xf32> to vector<1x24xf32>
    %73 = vector.extract_strided_slice %44 {offsets = [19, 0], sizes = [1, 24], strides = [1, 1]} : vector<23x24xf32> to vector<1x24xf32>
    %74 = arith.maximumf %72, %73 : vector<1x24xf32>
    %75 = vector.extract_strided_slice %44 {offsets = [20, 0], sizes = [1, 24], strides = [1, 1]} : vector<23x24xf32> to vector<1x24xf32>
    %76 = vector.extract_strided_slice %44 {offsets = [21, 0], sizes = [1, 24], strides = [1, 1]} : vector<23x24xf32> to vector<1x24xf32>
    %77 = arith.maximumf %75, %76 : vector<1x24xf32>
    %78 = tpu.concatenate %47, %50, %53, %56, %59, %62, %65, %68, %71, %74, %77 in 0 : vector<1x24xf32>, vector<1x24xf32>, vector<1x24xf32>, vector<1x24xf32>, vector<1x24xf32>, vector<1x24xf32>, vector<1x24xf32>, vector<1x24xf32>, vector<1x24xf32>, vector<1x24xf32>, vector<1x24xf32> -> vector<11x24xf32>
    %79 = vector.extract_strided_slice %7 {offsets = [32, 0], sizes = [32, 32], strides = [1, 1]} : vector<64x32xf32> to vector<32x32xf32>
    %80 = vector.extract_strided_slice %79 {offsets = [0, 0], sizes = [29, 32], strides = [1, 1]} : vector<32x32xf32> to vector<29x32xf32>
    %81 = vector.extract_strided_slice %79 {offsets = [1, 0], sizes = [29, 32], strides = [1, 1]} : vector<32x32xf32> to vector<29x32xf32>
    %82 = vector.extract_strided_slice %79 {offsets = [2, 0], sizes = [29, 32], strides = [1, 1]} : vector<32x32xf32> to vector<29x32xf32>
    %83 = vector.extract_strided_slice %79 {offsets = [3, 0], sizes = [29, 32], strides = [1, 1]} : vector<32x32xf32> to vector<29x32xf32>
    %84 = tpu.concatenate %80, %81, %82, %83 in 1 : vector<29x32xf32>, vector<29x32xf32>, vector<29x32xf32>, vector<29x32xf32> -> vector<29x128xf32>
    %cst_21 = arith.constant dense<0.000000e+00> : vector<29x8xf32>
    %85 = tpu.matmul %84, %8, %cst_21 {dimension_numbers = #tpu.dot_dimension_numbers<[1], [0], [0], [1], [0, 0, 1, 1], [], []>} : vector<29x128xf32>, vector<128x8xf32>, vector<29x8xf32> -> vector<29x8xf32>
    %86 = vector.broadcast %9 : vector<1x8xf32> to vector<29x8xf32>
    %87 = arith.addf %85, %86 : vector<29x8xf32>
    %cst_22 = arith.constant 0.000000e+00 : f32
    %88 = vector.broadcast %cst_22 : f32 to vector<29x8xf32>
    %89 = arith.maximumf %87, %88 : vector<29x8xf32>
    %90 = vector.extract_strided_slice %89 {offsets = [0, 0], sizes = [26, 8], strides = [1, 1]} : vector<29x8xf32> to vector<26x8xf32>
    %91 = vector.extract_strided_slice %89 {offsets = [1, 0], sizes = [26, 8], strides = [1, 1]} : vector<29x8xf32> to vector<26x8xf32>
    %92 = vector.extract_strided_slice %89 {offsets = [2, 0], sizes = [26, 8], strides = [1, 1]} : vector<29x8xf32> to vector<26x8xf32>
    %93 = vector.extract_strided_slice %89 {offsets = [3, 0], sizes = [26, 8], strides = [1, 1]} : vector<29x8xf32> to vector<26x8xf32>
    %94 = tpu.concatenate %90, %91, %92, %93 in 1 : vector<26x8xf32>, vector<26x8xf32>, vector<26x8xf32>, vector<26x8xf32> -> vector<26x32xf32>
    %cst_23 = arith.constant dense<0.000000e+00> : vector<26x16xf32>
    %95 = tpu.matmul %94, %10, %cst_23 {dimension_numbers = #tpu.dot_dimension_numbers<[1], [0], [0], [1], [0, 0, 1, 1], [], []>} : vector<26x32xf32>, vector<32x16xf32>, vector<26x16xf32> -> vector<26x16xf32>
    %96 = vector.broadcast %11 : vector<1x16xf32> to vector<26x16xf32>
    %97 = arith.addf %95, %96 : vector<26x16xf32>
    %cst_24 = arith.constant 0.000000e+00 : f32
    %98 = vector.broadcast %cst_24 : f32 to vector<26x16xf32>
    %99 = arith.maximumf %97, %98 : vector<26x16xf32>
    %100 = vector.extract_strided_slice %99 {offsets = [0, 0], sizes = [23, 16], strides = [1, 1]} : vector<26x16xf32> to vector<23x16xf32>
    %101 = vector.extract_strided_slice %99 {offsets = [1, 0], sizes = [23, 16], strides = [1, 1]} : vector<26x16xf32> to vector<23x16xf32>
    %102 = vector.extract_strided_slice %99 {offsets = [2, 0], sizes = [23, 16], strides = [1, 1]} : vector<26x16xf32> to vector<23x16xf32>
    %103 = vector.extract_strided_slice %99 {offsets = [3, 0], sizes = [23, 16], strides = [1, 1]} : vector<26x16xf32> to vector<23x16xf32>
    %104 = tpu.concatenate %100, %101, %102, %103 in 1 : vector<23x16xf32>, vector<23x16xf32>, vector<23x16xf32>, vector<23x16xf32> -> vector<23x64xf32>
    %cst_25 = arith.constant dense<0.000000e+00> : vector<23x24xf32>
    %105 = tpu.matmul %104, %12, %cst_25 {dimension_numbers = #tpu.dot_dimension_numbers<[1], [0], [0], [1], [0, 0, 1, 1], [], []>} : vector<23x64xf32>, vector<64x24xf32>, vector<23x24xf32> -> vector<23x24xf32>
    %106 = vector.broadcast %13 : vector<1x24xf32> to vector<23x24xf32>
    %107 = arith.addf %105, %106 : vector<23x24xf32>
    %cst_26 = arith.constant 0.000000e+00 : f32
    %108 = vector.broadcast %cst_26 : f32 to vector<23x24xf32>
    %109 = arith.maximumf %107, %108 : vector<23x24xf32>
    %110 = vector.extract_strided_slice %109 {offsets = [0, 0], sizes = [1, 24], strides = [1, 1]} : vector<23x24xf32> to vector<1x24xf32>
    %111 = vector.extract_strided_slice %109 {offsets = [1, 0], sizes = [1, 24], strides = [1, 1]} : vector<23x24xf32> to vector<1x24xf32>
    %112 = arith.maximumf %110, %111 : vector<1x24xf32>
    %113 = vector.extract_strided_slice %109 {offsets = [2, 0], sizes = [1, 24], strides = [1, 1]} : vector<23x24xf32> to vector<1x24xf32>
    %114 = vector.extract_strided_slice %109 {offsets = [3, 0], sizes = [1, 24], strides = [1, 1]} : vector<23x24xf32> to vector<1x24xf32>
    %115 = arith.maximumf %113, %114 : vector<1x24xf32>
    %116 = vector.extract_strided_slice %109 {offsets = [4, 0], sizes = [1, 24], strides = [1, 1]} : vector<23x24xf32> to vector<1x24xf32>
    %117 = vector.extract_strided_slice %109 {offsets = [5, 0], sizes = [1, 24], strides = [1, 1]} : vector<23x24xf32> to vector<1x24xf32>
    %118 = arith.maximumf %116, %117 : vector<1x24xf32>
    %119 = vector.extract_strided_slice %109 {offsets = [6, 0], sizes = [1, 24], strides = [1, 1]} : vector<23x24xf32> to vector<1x24xf32>
    %120 = vector.extract_strided_slice %109 {offsets = [7, 0], sizes = [1, 24], strides = [1, 1]} : vector<23x24xf32> to vector<1x24xf32>
    %121 = arith.maximumf %119, %120 : vector<1x24xf32>
    %122 = vector.extract_strided_slice %109 {offsets = [8, 0], sizes = [1, 24], strides = [1, 1]} : vector<23x24xf32> to vector<1x24xf32>
    %123 = vector.extract_strided_slice %109 {offsets = [9, 0], sizes = [1, 24], strides = [1, 1]} : vector<23x24xf32> to vector<1x24xf32>
    %124 = arith.maximumf %122, %123 : vector<1x24xf32>
    %125 = vector.extract_strided_slice %109 {offsets = [10, 0], sizes = [1, 24], strides = [1, 1]} : vector<23x24xf32> to vector<1x24xf32>
    %126 = vector.extract_strided_slice %109 {offsets = [11, 0], sizes = [1, 24], strides = [1, 1]} : vector<23x24xf32> to vector<1x24xf32>
    %127 = arith.maximumf %125, %126 : vector<1x24xf32>
    %128 = vector.extract_strided_slice %109 {offsets = [12, 0], sizes = [1, 24], strides = [1, 1]} : vector<23x24xf32> to vector<1x24xf32>
    %129 = vector.extract_strided_slice %109 {offsets = [13, 0], sizes = [1, 24], strides = [1, 1]} : vector<23x24xf32> to vector<1x24xf32>
    %130 = arith.maximumf %128, %129 : vector<1x24xf32>
    %131 = vector.extract_strided_slice %109 {offsets = [14, 0], sizes = [1, 24], strides = [1, 1]} : vector<23x24xf32> to vector<1x24xf32>
    %132 = vector.extract_strided_slice %109 {offsets = [15, 0], sizes = [1, 24], strides = [1, 1]} : vector<23x24xf32> to vector<1x24xf32>
    %133 = arith.maximumf %131, %132 : vector<1x24xf32>
    %134 = vector.extract_strided_slice %109 {offsets = [16, 0], sizes = [1, 24], strides = [1, 1]} : vector<23x24xf32> to vector<1x24xf32>
    %135 = vector.extract_strided_slice %109 {offsets = [17, 0], sizes = [1, 24], strides = [1, 1]} : vector<23x24xf32> to vector<1x24xf32>
    %136 = arith.maximumf %134, %135 : vector<1x24xf32>
    %137 = vector.extract_strided_slice %109 {offsets = [18, 0], sizes = [1, 24], strides = [1, 1]} : vector<23x24xf32> to vector<1x24xf32>
    %138 = vector.extract_strided_slice %109 {offsets = [19, 0], sizes = [1, 24], strides = [1, 1]} : vector<23x24xf32> to vector<1x24xf32>
    %139 = arith.maximumf %137, %138 : vector<1x24xf32>
    %140 = vector.extract_strided_slice %109 {offsets = [20, 0], sizes = [1, 24], strides = [1, 1]} : vector<23x24xf32> to vector<1x24xf32>
    %141 = vector.extract_strided_slice %109 {offsets = [21, 0], sizes = [1, 24], strides = [1, 1]} : vector<23x24xf32> to vector<1x24xf32>
    %142 = arith.maximumf %140, %141 : vector<1x24xf32>
    %143 = tpu.concatenate %112, %115, %118, %121, %124, %127, %130, %133, %136, %139, %142 in 0 : vector<1x24xf32>, vector<1x24xf32>, vector<1x24xf32>, vector<1x24xf32>, vector<1x24xf32>, vector<1x24xf32>, vector<1x24xf32>, vector<1x24xf32>, vector<1x24xf32>, vector<1x24xf32>, vector<1x24xf32> -> vector<11x24xf32>
    %144 = vector.shape_cast %78 : vector<11x24xf32> to vector<1x11x24xf32>
    %145 = vector.shape_cast %143 : vector<11x24xf32> to vector<1x11x24xf32>
    %146 = tpu.concatenate %144, %145 in 0 : vector<1x11x24xf32>, vector<1x11x24xf32> -> vector<2x11x24xf32>
    %c0_27 = arith.constant 0 : index
    %c0_28 = arith.constant 0 : index
    %c0_29 = arith.constant 0 : index
    %147 = vector.load %arg9[%c0_27, %c0_28, %c0_29] : memref<2x11x24xf32, #tpu.memory_space<vmem>>, vector<2x11x24xf32>
    tpu.vector_store %arg9[%c0_27, %c0_28, %c0_29], %146 {strides = array<i32>} : memref<2x11x24xf32, #tpu.memory_space<vmem>>, vector<2x11x24xf32>,
    return
  }
  func.func @transform_0(%arg0: i32) -> (i32, i32) {
    %c0_i32 = arith.constant 0 : i32
    %c0_i32_0 = arith.constant 0 : i32
    return %arg0, %c0_i32 : i32, i32
  }
  func.func @transform_1(%arg0: i32) -> (i32, i32) {
    %c0_i32 = arith.constant 0 : i32
    %c0_i32_0 = arith.constant 0 : i32
    %c0_i32_1 = arith.constant 0 : i32
    return %c0_i32, %c0_i32_0 : i32, i32
  }
  func.func @transform_2(%arg0: i32) -> (i32, i32) {
    %c0_i32 = arith.constant 0 : i32
    %c0_i32_0 = arith.constant 0 : i32
    %c0_i32_1 = arith.constant 0 : i32
    return %c0_i32, %c0_i32_0 : i32, i32
  }
  func.func @transform_3(%arg0: i32) -> (i32, i32) {
    %c0_i32 = arith.constant 0 : i32
    %c0_i32_0 = arith.constant 0 : i32
    %c0_i32_1 = arith.constant 0 : i32
    return %c0_i32, %c0_i32_0 : i32, i32
  }
  func.func @transform_4(%arg0: i32) -> (i32, i32) {
    %c0_i32 = arith.constant 0 : i32
    %c0_i32_0 = arith.constant 0 : i32
    %c0_i32_1 = arith.constant 0 : i32
    return %c0_i32, %c0_i32_0 : i32, i32
  }
  func.func @transform_5(%arg0: i32) -> (i32, i32) {
    %c0_i32 = arith.constant 0 : i32
    %c0_i32_0 = arith.constant 0 : i32
    %c0_i32_1 = arith.constant 0 : i32
    return %c0_i32, %c0_i32_0 : i32, i32
  }
  func.func @transform_6(%arg0: i32) -> (i32, i32) {
    %c0_i32 = arith.constant 0 : i32
    %c0_i32_0 = arith.constant 0 : i32
    %c0_i32_1 = arith.constant 0 : i32
    return %c0_i32, %c0_i32_0 : i32, i32
  }
  func.func @transform_7(%arg0: i32) -> (i32, i32) {
    %c0_i32 = arith.constant 0 : i32
    %c0_i32_0 = arith.constant 0 : i32
    %c0_i32_1 = arith.constant 0 : i32
    return %c0_i32, %c0_i32_0 : i32, i32
  }
  func.func @transform_8(%arg0: i32) -> (i32, i32, i32) {
    %c0_i32 = arith.constant 0 : i32
    %c0_i32_0 = arith.constant 0 : i32
    %c0_i32_1 = arith.constant 0 : i32
    return %arg0, %c0_i32, %c0_i32_0 : i32, i32, i32
  }
}

</mosaic_0001>

<bundles_post_ra>
// kernel: drug_block_forward.1
= control target key start
LH: loop header
LB: loop body
LE: loop exit
PB: predicated region body
PF: predicated region fallthrough
CT: control target
= control target key end

     0   :  { %v1856_v0 = vmov 0   ;;  %v37_v17 = vlaneseq  ;;  %vm95_vm0 = vcmask 523264   ;;  %v1857_v21 = vmov 0.0   ;;  %s1859_s15 = smov 32   ;;  %s1860_s16 = smov 96   ;;  %s2531_s0 = inlined_call_operand.vmem [shape: s32[64,1], index: 0, kind: input, shape index: {}]   ;;  %s2532_s1 = inlined_call_operand.vmem [shape: f32[64,32], index: 1, kind: input, shape index: {}]   ;;  %s2533_s2 = inlined_call_operand.vmem [shape: f32[128,8], index: 2, kind: input, shape index: {}]   ;;  %s2534_s3 = inlined_call_operand.vmem [shape: f32[1,8], index: 3, kind: input, shape index: {}]   ;;  %s2535_s4 = inlined_call_operand.vmem [shape: f32[32,16], index: 4, kind: input, shape index: {}]   ;;  %s2536_s6 = inlined_call_operand.vmem [shape: f32[64,24], index: 6, kind: input, shape index: {}]   ;;  %s2537_s5 = inlined_call_operand.vmem [shape: f32[1,16], index: 5, kind: input, shape index: {}]   ;;  %s2538_s7 = inlined_call_operand.vmem [shape: f32[1,24], index: 7, kind: input, shape index: {}]   ;;  %s2539_s8 = inlined_call_operand.vmem [shape: f32[2,11,24], index: 8, kind: output, shape index: {}]  }
   0x1   :  { %1795 = vset.pattern.permute.xlu1 %v1856_v0  ;;  %1794 = vset.pattern.permute.xlu0 %v1856_v0  ;;  %v31_v1 = vld [vmem:[%s2531_s0 + $0x10] sm:$0xff]  ;;  %v29_v2 = vld [vmem:[%s2531_s0] sm:$0xff]  ;;  %v32_v3 = vld [vmem:[%s2531_s0 + $0x18] sm:$0xff]  ;;  %vm280_vm5 = vcmask 1045504   ;;  %vm260_vm6 = vcmask 1046528   ;;  %vm300_vm7 = vcmask 1044480  }
   0x2   :  { %46 = vperm.xlu1 %1795, %v31_v1   ;;  %40 = vperm.xlu0 %1794, %v29_v2   ;;  %v87_v4 = vld [vmem:[%s2532_s1] sm:$0xff]  ;;  %v88_v5 = vld [vmem:[%s2532_s1 + $0x8] sm:$0xff]  ;;  %v89_v8 = vld [vmem:[%s2532_s1 + $0x10] sm:$0xff]  ;;  %v1948_v18 = vand.u32 127, %v37_v17  ;;  %vm320_vm8 = vcmask 261120   ;;  %vm329_vm9 = vcmask 785408  }
   0x3   :  { %v30_v6 = vld [vmem:[%s2531_s0 + $0x8] sm:$0xff]  ;;  %v1663_v7 = vpack.c.bf16 %v88_v5, %v87_v4  ;;  %v90_v9 = vld [vmem:[%s2532_s1 + $0x18] sm:$0xff]  ;;  %v91_v11 = vld [vmem:[%s2532_s1 + $0x20] sm:$0xff]  ;;  %s1862_s10 = smov 16   ;;  %s1863_s11 = smov 24   ;;  %vm490_vm14 = vcmask 64512  }
   0x4   :  { %v1667_v10 = vpack.c.bf16 %v90_v9, %v89_v8  ;;  %v92_v12 = vld [vmem:[%s2532_s1 + $0x28] sm:$0xff]  ;;  %v93_v14 = vld [vmem:[%s2532_s1 + $0x30] sm:$0xff]  ;;  %v94_v15 = vld [vmem:[%s2532_s1 + $0x38] sm:$0xff]  ;;  %vm495_vm15 = vcmask 130048  }
   0x5   :  { %1664 = vmatprep.subr.bf16.mxu0 %v1663_v7  ;;  %v1671_v13 = vpack.c.bf16 %v92_v12, %v91_v11  ;;  %v1675_v16 = vpack.c.bf16 %v94_v15, %v93_v14  ;;  %v225_v28 = vld [vmem:[%s2533_s2] sm:$0xff]  ;;  %v226_v29 = vld [vmem:[%s2533_s2 + $0x8] sm:$0xff]  ;;  %v227_v30 = vld [vmem:[%s2533_s2 + $0x10] sm:$0xff] }
   0x6   :  { %49 = vperm.xlu1 %1795, %v32_v3   ;;  %43 = vperm.xlu0 %1794, %v30_v6   ;;  %v1971_v31 = vpack.c.bf16 %v226_v29, %v225_v28  ;;  %v228_v32 = vld [vmem:[%s2533_s2 + $0x18] sm:$0xff]  ;;  %v229_v34 = vld [vmem:[%s2533_s2 + $0x20] sm:$0xff]  ;;  %v230_v35 = vld [vmem:[%s2533_s2 + $0x28] sm:$0xff] }
   0x7   :  { %1666 = vmatpush3.bf16.msra.mxu0 %v1663_v7  ;;  %v1976_v33 = vpack.c.bf16 %v228_v32, %v227_v30  ;;  %v1987_v36 = vpack.c.bf16 %v230_v35, %v229_v34  ;;  %v231_v37 = vld [vmem:[%s2533_s2 + $0x30] sm:$0xff]  ;;  %v232_v38 = vld [vmem:[%s2533_s2 + $0x38] sm:$0xff]  ;;  %v233_v40 = vld [vmem:[%s2533_s2 + $0x40] sm:$0xff] }
   0x8   :  { %1668 = vmatprep.subr.bf16.mxu0 %v1667_v10  ;;  %1680 = vmatprep.subr.bf16.mxu1 %v1971_v31  ;;  %v1997_v39 = vpack.c.bf16 %v232_v38, %v231_v37  ;;  %v234_v41 = vld [vmem:[%s2533_s2 + $0x48] sm:$0xff]  ;;  %v235_v43 = vld [vmem:[%s2533_s2 + $0x50] sm:$0xff]  ;;  %v236_v44 = vld [vmem:[%s2533_s2 + $0x58] sm:$0xff] }
   0x9   :  { %1682 = vmatpush3.bf16.msra.mxu1 %v1971_v31  ;;  %v2007_v42 = vpack.c.bf16 %v234_v41, %v233_v40  ;;  %v2017_v45 = vpack.c.bf16 %v236_v44, %v235_v43  ;;  %v237_v46 = vld [vmem:[%s2533_s2 + $0x60] sm:$0xff]  ;;  %v238_v47 = vld [vmem:[%s2533_s2 + $0x68] sm:$0xff]  ;;  %v239_v54 = vld [vmem:[%s2533_s2 + $0x70] sm:$0xff] }
   0xa   :  { %1684 = vmatprep.subr.bf16.mxu1 %v1976_v33  ;;  %v2028_v48 = vpack.c.bf16 %v238_v47, %v237_v46  ;;  %v240_v55 = vld [vmem:[%s2533_s2 + $0x78] sm:$0xff]  ;;  %s1858_s2 = smov 64  }
   0xb   :  { %1670 = vmatpush3.bf16.msra.mxu0 %v1667_v10  ;;  %v2043_v59 = vpack.c.bf16 %v240_v55, %v239_v54 }
   0xc   :  { %1672 = vmatprep.subr.bf16.mxu0 %v1671_v13 }
   0xd   :  { %1686 = vmatpush3.bf16.msra.mxu1 %v1976_v33 }
   0xe   :  { %1688 = vmatprep.subr.bf16.mxu1 %v1987_v36 }
   0xf   :  { %1674 = vmatpush3.bf16.msra.mxu0 %v1671_v13 }
  0x10   :  { %1676 = vmatprep.subr.bf16.mxu0 %v1675_v16 }
  0x11   :  { %1690 = vmatpush3.bf16.msra.mxu1 %v1987_v36 }
  0x12   :  { %1692 = vmatprep.subr.bf16.mxu1 %v1997_v39 }
  0x13   :  { %1678 = vmatpush3.bf16.msra.mxu0 %v1675_v16 }
  0x15   :  { %1694 = vmatpush3.bf16.msra.mxu1 %v1997_v39 }
  0x16   :  { %1696 = vmatprep.subr.bf16.mxu1 %v2007_v42 }
  0x19   :  { %1698 = vmatpush3.bf16.msra.mxu1 %v2007_v42 }
  0x1a   :  { %1700 = vmatprep.subr.bf16.mxu1 %v2017_v45 }
  0x1d   :  { %1702 = vmatpush3.bf16.msra.mxu1 %v2017_v45 }
  0x1e   :  { %1704 = vmatprep.subr.bf16.mxu1 %v2028_v48 }
  0x21   :  { %1706 = vmatpush3.bf16.msra.mxu1 %v2028_v48 }
  0x22   :  { %1708 = vmatprep.subr.bf16.mxu1 %v2043_v59 }
  0x25   :  { %1710 = vmatpush3.bf16.msra.mxu1 %v2043_v59 }
  0x81   :  { %v47_v19 = vpop.permute.xlu1 %46  ;;  %v41_v20 = vpop.permute.xlu0 %40 }
  0x82   :  { %vm63_vm1 = vcmp.eq.s32.totalorder %v41_v20, %v1948_v18  ;;  %vm65_vm2 = vcmp.eq.s32.totalorder %v47_v19, %v1948_v18  ;;  %v34_v20 = vld [vmem:[%s2531_s0 + $0x28] sm:$0xff] }
  0x83   :  { %v1354_v22 = vsel %vm63_vm1, 1.0, %v1857_v21  ;;  %v1356_v25 = vsel %vm65_vm2, 1.0, %v1857_v21  ;;  %vm500_vm1 = vcmask 195584   ;;  %vm1865_vm2 = vmmov 0  }
  0x84   :  { %1497 = vmatprep.mubr.msk.f32.mxu0 %vm95_vm0, %v1354_v22  ;;  %v33_v22 = vld [vmem:[%s2531_s0 + $0x20] sm:$0xff] }
  0x85   :  { %v50_v23 = vpop.permute.xlu1 %49  ;;  %v44_v24 = vpop.permute.xlu0 %43 }
  0x86   :  { %vm64_vm3 = vcmp.eq.s32.totalorder %v44_v24, %v1948_v18  ;;  %vm66_vm4 = vcmp.eq.s32.totalorder %v50_v23, %v1948_v18  ;;  %v36_v23 = vld [vmem:[%s2531_s0 + $0x38] sm:$0xff]  ;;  %v35_v24 = vld [vmem:[%s2531_s0 + $0x30] sm:$0xff] }
  0x87   :  { %v1355_v26 = vsel %vm64_vm3, 1.0, %v1857_v21  ;;  %v1357_v27 = vsel %vm66_vm4, 1.0, %v1857_v21  ;;  %vm668_vm3 = vcmask 392192   ;;  %vm803_vm4 = vcmask 1040384  }
  0x88   :  { %1498 = vmatmul.mubr.msk.f32.vlgmr.msra.gmra.mrb[0].mxu0 %vm95_vm0, %v1355_v26 }
  0x89   :  { %1500 = vmatprep.mubr.msk.f32.mxu0 %vm95_vm0, %v1356_v25 }
  0x8c   :  { %1501 = vmatmul.mubr.msk.f32.gmra.mrb[2].mxu0 %vm95_vm0, %v1357_v27 }
 0x15b   :  { %v2030_v49 = vpop.f32.mrb[0].mxu0 }
 0x15c   :  { %v262_v50 = vrot.slane %v2030_v49, 1  ;;  %v282_v51 = vrot.slane %v2030_v49, 2  ;;  %v302_v52 = vrot.slane %v2030_v49, 3  ;;  %v186_v53 = vpop.f32.mrb[1].mxu0 }
 0x15d   :  { %v261_v56 = vrot.slane %v186_v53, 1  ;;  %v281_v57 = vrot.slane %v186_v53, 2  ;;  %v301_v58 = vrot.slane %v186_v53, 3 }
 0x15f   :  { %v2045_v60 = vpop.f32.mrb[2].mxu0  ;;  %v283_v61 = vsel %vm280_vm5, %v281_v57, %v282_v51  ;;  %v263_v62 = vsel %vm260_vm6, %v261_v56, %v262_v50  ;;  %v303_v63 = vsel %vm300_vm7, %v301_v58, %v302_v52 }
 0x160   :  { %v266_v0 = vrot.slane %v2045_v60, 1  ;;  %v286_v1 = vrot.slane %v2045_v60, 2  ;;  %v2053_v2 = vpop.f32.mrb[3].mxu0  ;;  %v306_v3 = vrot.slane %v2045_v60, 3 }
 0x161   :  { %v264_v4 = vrot.slane %v2053_v2, 1  ;;  %v284_v5 = vrot.slane %v2053_v2, 2  ;;  %v304_v6 = vrot.slane %v2053_v2, 3 }
 0x163   :  { %v285_v7 = vsel %vm280_vm5, %v282_v51, %v284_v5  ;;  %v265_v8 = vsel %vm260_vm6, %v262_v50, %v264_v4  ;;  %v267_v9 = vsel %vm260_vm6, %v264_v4, %v266_v0  ;;  %v305_v10 = vsel %vm300_vm7, %v302_v52, %v304_v6 }
 0x164   :  { %v1801_v11 = vpack.i.bf16 %v285_v7, %v283_v61  ;;  %v1796_v12 = vpack.i.bf16 %v265_v8, %v263_v62  ;;  %v1811_v13 = vpack.i.bf16 %v266_v0, %v267_v9  ;;  %v1806_v14 = vpack.i.bf16 %v305_v10, %v303_v63  ;;  %v2114_v7 = vld [vmem:[%s2534_s3] ss:$0 sm:$0xff] }
 0x165   :  { %v307_v15 = vsel %vm300_vm7, %v304_v6, %v306_v3  ;;  %v287_v16 = vsel %vm280_vm5, %v284_v5, %v286_v1  ;;  %v242_v9 = vld [vmem:[%s2535_s4] sm:$0xff] }
 0x166   :  { %1802 = vrot.lane.b32.xlu1 %v1801_v11, %s1858_s2  ;;  %1797 = vrot.lane.b32.xlu0 %v1796_v12, %s1859_s15  ;;  %v1821_v17 = vpack.i.bf16 %v306_v3, %v307_v15  ;;  %v1816_v19 = vpack.i.bf16 %v286_v1, %v287_v16  ;;  %v244_v16 = vld [vmem:[%s2535_s4 + $0x10] sm:$0xff] }
 0x16a   :  { %1812 = vrot.lane.b32.xlu1 %v1811_v13, %s1859_s15  ;;  %1807 = vrot.lane.b32.xlu0 %v1806_v14, %s1860_s16 }
 0x16e   :  { %1822 = vrot.lane.b32.xlu1 %v1821_v17, %s1860_s16  ;;  %1817 = vrot.lane.b32.xlu0 %v1816_v19, %s1858_s2  ;;  %v245_v17 = vld [vmem:[%s2535_s4 + $0x18] sm:$0xff] }
 0x172   :  { %55 = vperm.xlu1 %1795, %v34_v20   ;;  %52 = vperm.xlu0 %1794, %v33_v22   ;;  %v2139_v22 = vpack.c.bf16 %v245_v17, %v244_v16 }
 0x176   :  { %61 = vperm.xlu1 %1795, %v36_v23   ;;  %58 = vperm.xlu0 %1794, %v35_v24  }
 0x1d8   :  { %v1803_v25 = vpop.permute.xlu1 %1802  ;;  %v1798_v26 = vpop.permute.xlu0 %1797 }
 0x1d9   :  { %v1800_v27 = vunpack.i.h.bf16 %v1798_v26  ;;  %v1799_v28 = vunpack.i.l.bf16 %v1798_v26  ;;  %v1805_v29 = vunpack.i.h.bf16 %v1803_v25  ;;  %v1804_v30 = vunpack.i.l.bf16 %v1803_v25 }
 0x1db   :  { %v321_v32 = vsel %vm320_vm8, %v186_v53, %v1799_v28  ;;  %v322_v34 = vsel %vm320_vm8, %v2030_v49, %v1800_v27 }
 0x1dc   :  { %v1813_v35 = vpop.permute.xlu1 %1812  ;;  %v1808_v37 = vpop.permute.xlu0 %1807  ;;  %v325_v44 = vsel %vm95_vm0, %v321_v32, %v1804_v30  ;;  %v326_v46 = vsel %vm95_vm0, %v322_v34, %v1805_v29 }
 0x1dd   :  { %v1810_v38 = vunpack.i.h.bf16 %v1808_v37  ;;  %v1809_v40 = vunpack.i.l.bf16 %v1808_v37  ;;  %v1815_v41 = vunpack.i.h.bf16 %v1813_v35  ;;  %v1814_v43 = vunpack.i.l.bf16 %v1813_v35 }
 0x1df   :  { %v330_v47 = vsel %vm329_vm9, %v325_v44, %v1809_v40  ;;  %v331_v50 = vsel %vm329_vm9, %v326_v46, %v1810_v38  ;;  %v323_v56 = vsel %vm320_vm8, %v2053_v2, %v1814_v43  ;;  %v324_v57 = vsel %vm320_vm8, %v2045_v60, %v1815_v41 }
 0x1e0   :  { %v1823_v51 = vpop.permute.xlu1 %1822  ;;  %v1818_v52 = vpop.permute.xlu0 %1817  ;;  %1541 = vmatprep.mubr.f32.mxu1 %v330_v47 }
 0x1e1   :  { %v1825_v53 = vunpack.i.h.bf16 %v1823_v51  ;;  %v1824_v49 = vunpack.i.l.bf16 %v1823_v51  ;;  %v1820_v54 = vunpack.i.h.bf16 %v1818_v52  ;;  %v1819_v55 = vunpack.i.l.bf16 %v1818_v52  ;;  %1542 = vmatmul.mubr.f32.vlgmr.msra.gmra.mrb[0].mxu1 %v331_v50 }
 0x1e3   :  { %v327_v58 = vsel %vm95_vm0, %v323_v56, %v1819_v55  ;;  %v328_v61 = vsel %vm95_vm0, %v324_v57, %v1820_v54 }
 0x1e4   :  { %v332_v62 = vsel %vm329_vm9, %v327_v58, %v1824_v49  ;;  %v333_v63 = vsel %vm329_vm9, %v328_v61, %v1825_v53 }
 0x1e5   :  { %1544 = vmatprep.mubr.f32.mxu1 %v332_v62 }
 0x1e6   :  { %1545 = vmatmul.mubr.f32.gmra.mrb[2].mxu1 %v333_v63 }
 0x1f1   :  { %v56_v0 = vpop.permute.xlu1 %55  ;;  %v53_v1 = vpop.permute.xlu0 %52 }
 0x1f2   :  { %vm68_vm10 = vcmp.eq.s32.totalorder %v56_v0, %v1948_v18  ;;  %vm67_vm11 = vcmp.eq.s32.totalorder %v53_v1, %v1948_v18 }
 0x1f3   :  { %v1359_v2 = vsel %vm68_vm10, 1.0, %v1857_v21  ;;  %v1358_v60 = vsel %vm67_vm11, 1.0, %v1857_v21  ;;  %vm807_vm10 = vcmask 1042432   ;;  %vm809_vm11 = vcmask 1043456  }
 0x1f4   :  { %1503 = vmatprep.mubr.msk.f32.mxu0 %vm95_vm0, %v1358_v60 }
 0x1f5   :  { %v62_v3 = vpop.permute.xlu1 %61  ;;  %1504 = vmatmul.mubr.msk.f32.gmra.mrb[4].mxu0 %vm95_vm0, %v1359_v2  ;;  %v59_v4 = vpop.permute.xlu0 %58 }
 0x1f6   :  { %vm70_vm12 = vcmp.eq.s32.totalorder %v62_v3, %v1948_v18  ;;  %vm69_vm13 = vcmp.eq.s32.totalorder %v59_v4, %v1948_v18  ;;  %v243_v18 = vld [vmem:[%s2535_s4 + $0x8] sm:$0xff]  ;;  %s1861_s4 = smov 8  }
 0x1f7   :  { %v1361_v5 = vsel %vm70_vm12, 1.0, %v1857_v21  ;;  %v1360_v6 = vsel %vm69_vm13, 1.0, %v1857_v21  ;;  %v2123_v12 = vpack.c.bf16 %v243_v18, %v242_v9  ;;  %vm1346_vm12 = vcmask 190464  }
 0x1f8   :  { %1506 = vmatprep.mubr.msk.f32.mxu0 %vm95_vm0, %v1360_v6 }
 0x1f9   :  { %1507 = vmatmul.mubr.msk.f32.gmra.mrb[6].mxu0 %vm95_vm0, %v1361_v5  ;;  %1712 = vmatprep.subr.bf16.mxu1 %v2123_v12 }
 0x1fa   :  { %1714 = vmatpush3.bf16.msra.mxu1 %v2123_v12  ;;  %1577 = vmatprep.mubr.msk.f32.mxu0 %vm1865_vm2, %v1857_v21 }
 0x1fb   :  { %1716 = vmatprep.subr.bf16.mxu1 %v2139_v22 }
 0x1fe   :  { %1718 = vmatpush3.bf16.msra.mxu1 %v2139_v22 }
 0x1ff   :  { %1732 = vmatprep.subr.bf16.mxu1 %v1971_v31 }
 0x2b4   :  { %v1543_v8 = vpop.f32.mrb[0].mxu1 }
 0x2b5   :  { %v412_v10 = vadd.f32 %v1543_v8, %v2114_v7  ;;  %v406_v11 = vpop.f32.mrb[1].mxu1 }
 0x2b6   :  { %v407_v13 = vadd.f32 %v2114_v7, %v406_v11 }
 0x2b7   :  { %v2126_v14 = vmax.f32 %v412_v10, 0.0 }
 0x2b8   :  { %v2129_v15 = vmax.f32 %v407_v13, 0.0 }
 0x2b9   :  { %v1546_v19 = vpop.f32.mrb[2].mxu1  ;;  %v434_v20 = vrot.slane %v2126_v14, 1  ;;  %v453_v28 = vrot.slane %v2126_v14, 2  ;;  %v472_v35 = vrot.slane %v2126_v14, 3 }
 0x2ba   :  { %v416_v23 = vpop.f32.mrb[3].mxu1  ;;  %v433_v24 = vrot.slane %v2129_v15, 1  ;;  %v452_v27 = vrot.slane %v2129_v15, 2  ;;  %v471_v34 = vrot.slane %v2129_v15, 3  ;;  %v422_v40 = vadd.f32 %v1546_v19, %v2114_v7 }
 0x2bb   :  { %v417_v25 = vadd.f32 %v2114_v7, %v416_v23 }
 0x2bc   :  { %v435_v26 = vsel %vm260_vm6, %v433_v24, %v434_v20  ;;  %v454_v32 = vsel %vm280_vm5, %v452_v27, %v453_v28  ;;  %v473_v41 = vsel %vm300_vm7, %v471_v34, %v472_v35  ;;  %v2166_v46 = vmax.f32 %v422_v40, 0.0 }
 0x2bd   :  { %v2148_v29 = vmax.f32 %v417_v25, 0.0  ;;  %440 = vrot.lane.b32.xlu0 %v435_v26, %s1861_s4 }
 0x2be   :  { %v438_v58 = vrot.slane %v2166_v46, 1  ;;  %v457_v6 = vrot.slane %v2166_v46, 2  ;;  %v476_v25 = vrot.slane %v2166_v46, 3 }
 0x2bf   :  { %v436_v30 = vrot.slane %v2148_v29, 1  ;;  %v455_v38 = vrot.slane %v2148_v29, 2  ;;  %v474_v44 = vrot.slane %v2148_v29, 3 }
 0x2c1   :  { %459 = vrot.lane.b32.xlu0 %v454_v32, %s1862_s10  ;;  %v437_v37 = vsel %vm260_vm6, %v434_v20, %v436_v30  ;;  %v456_v43 = vsel %vm280_vm5, %v453_v28, %v455_v38  ;;  %v475_v49 = vsel %vm300_vm7, %v472_v35, %v474_v44  ;;  %v439_v26 = vsel %vm260_vm6, %v436_v30, %v438_v58 }
 0x2c2   :  { %442 = vrot.lane.b32.xlu1 %v437_v37, %s1861_s4  ;;  %v458_v27 = vsel %vm280_vm5, %v455_v38, %v457_v6  ;;  %v477_v28 = vsel %vm300_vm7, %v474_v44, %v476_v25 }
 0x2c5   :  { %478 = vrot.lane.b32.xlu0 %v473_v41, %s1863_s11 }
 0x2c6   :  { %461 = vrot.lane.b32.xlu1 %v456_v43, %s1862_s10 }
 0x2c8   :  { %v2168_v47 = vpop.f32.mrb[4].mxu0 }
 0x2c9   :  { %v821_v50 = vrot.slane %v2168_v47, 1  ;;  %v840_v51 = vrot.slane %v2168_v47, 2  ;;  %v859_v52 = vrot.slane %v2168_v47, 3  ;;  %v2173_v53 = vpop.f32.mrb[5].mxu0 }
 0x2ca   :  { %v820_v54 = vrot.slane %v2173_v53, 1  ;;  %v839_v55 = vrot.slane %v2173_v53, 2  ;;  %v858_v56 = vrot.slane %v2173_v53, 3  ;;  %480 = vrot.lane.b32.xlu1 %v475_v49, %s1863_s11 }
 0x2cc   :  { %v2180_v57 = vpop.f32.mrb[6].mxu0  ;;  %v822_v61 = vsel %vm260_vm6, %v820_v54, %v821_v50  ;;  %v841_v62 = vsel %vm280_vm5, %v839_v55, %v840_v51  ;;  %v860_v63 = vsel %vm300_vm7, %v858_v56, %v859_v52 }
 0x2cd   :  { %v825_v0 = vrot.slane %v2180_v57, 1  ;;  %v863_v1 = vrot.slane %v2180_v57, 3  ;;  %v2188_v2 = vpop.f32.mrb[7].mxu0  ;;  %v844_v60 = vrot.slane %v2180_v57, 2 }
 0x2ce   :  { %v823_v3 = vrot.slane %v2188_v2, 1  ;;  %v842_v4 = vrot.slane %v2188_v2, 2  ;;  %v861_v5 = vrot.slane %v2188_v2, 3  ;;  %446 = vrot.lane.b32.xlu1 %v438_v58, %s1861_s4 }
 0x2d0   :  { %v824_v8 = vsel %vm260_vm6, %v821_v50, %v823_v3  ;;  %v843_v9 = vsel %vm280_vm5, %v840_v51, %v842_v4  ;;  %v826_v18 = vsel %vm260_vm6, %v823_v3, %v825_v0  ;;  %v864_v10 = vsel %vm300_vm7, %v861_v5, %v863_v1 }
 0x2d1   :  { %v1826_v11 = vpack.i.bf16 %v824_v8, %v822_v61  ;;  %v1831_v13 = vpack.i.bf16 %v843_v9, %v841_v62  ;;  %v1841_v16 = vpack.i.bf16 %v825_v0, %v826_v18  ;;  %v1851_v17 = vpack.i.bf16 %v863_v1, %v864_v10 }
 0x2d2   :  { %465 = vrot.lane.b32.xlu1 %v457_v6, %s1862_s10  ;;  %v862_v19 = vsel %vm300_vm7, %v859_v52, %v861_v5  ;;  %v845_v20 = vsel %vm280_vm5, %v842_v4, %v844_v60 }
 0x2d3   :  { %1827 = vrot.lane.b32.xlu0 %v1826_v11, %s1859_s15  ;;  %v1836_v23 = vpack.i.bf16 %v862_v19, %v860_v63  ;;  %v1846_v24 = vpack.i.bf16 %v844_v60, %v845_v20 }
 0x2d6   :  { %484 = vrot.lane.b32.xlu1 %v476_v25, %s1863_s11  ;;  %v247_v25 = vld [vmem:[%s2536_s6] sm:$0xff] }
 0x2d7   :  { %444 = vrot.lane.b32.xlu0 %v439_v26, %s1861_s4  ;;  %v248_v26 = vld [vmem:[%s2536_s6 + $0x8] sm:$0xff] }
 0x2da   :  { %1832 = vrot.lane.b32.xlu1 %v1831_v13, %s1858_s2 }
 0x2db   :  { %463 = vrot.lane.b32.xlu0 %v458_v27, %s1862_s10  ;;  %v2278_v27 = vpack.c.bf16 %v248_v26, %v247_v25 }
 0x2de   :  { %1842 = vrot.lane.b32.xlu1 %v1841_v16, %s1859_s15 }
 0x2df   :  { %482 = vrot.lane.b32.xlu0 %v477_v28, %s1863_s11  ;;  %v250_v28 = vld [vmem:[%s2536_s6 + $0x18] sm:$0xff] }
 0x2e2   :  { %1852 = vrot.lane.b32.xlu1 %v1851_v17, %s1860_s16 }
 0x2e3   :  { %1837 = vrot.lane.b32.xlu0 %v1836_v23, %s1860_s16 }
 0x2e7   :  { %1847 = vrot.lane.b32.xlu0 %v1846_v24, %s1858_s2 }
 0x32f   :  { %v441_v30 = vpop.permute.xlu0 %440 }
 0x330   :  { %v491_v35 = vsel %vm490_vm14, %v2129_v15, %v441_v30 }
 0x333   :  { %v460_v32 = vpop.permute.xlu0 %459 }
 0x334   :  { %v443_v34 = vpop.permute.xlu1 %442  ;;  %v496_v37 = vsel %vm495_vm15, %v491_v35, %v460_v32  ;;  %v251_v32 = vld [vmem:[%s2536_s6 + $0x20] sm:$0xff] }
 0x335   :  { %v492_v43 = vsel %vm490_vm14, %v2126_v14, %v443_v34  ;;  %v252_v34 = vld [vmem:[%s2536_s6 + $0x28] sm:$0xff] }
 0x336   :  { %v2294_v35 = vpack.c.bf16 %v252_v34, %v251_v32 }
 0x337   :  { %v479_v38 = vpop.permute.xlu0 %478 }
 0x338   :  { %v501_v40 = vsel %vm500_vm1, %v496_v37, %v479_v38  ;;  %v462_v41 = vpop.permute.xlu1 %461  ;;  %v253_v37 = vld [vmem:[%s2536_s6 + $0x30] sm:$0xff]  ;;  %v254_v38 = vld [vmem:[%s2536_s6 + $0x38] sm:$0xff] }
 0x339   :  { %1555 = vmatprep.mubr.msk.f32.mxu1 %vm320_vm8, %v501_v40  ;;  %v497_v44 = vsel %vm495_vm15, %v492_v43, %v462_v41  ;;  %v2305_v40 = vpack.c.bf16 %v254_v38, %v253_v37  ;;  %v2310_v41 = vld [vmem:[%s2537_s5] ss:$0 sm:$0xff]  ;;  %s1866_s5 = smov 48  }
 0x33c   :  { %v481_v50 = vpop.permute.xlu1 %480 }
 0x33d   :  { %v502_v51 = vsel %vm500_vm1, %v497_v44, %v481_v50 }
 0x33e   :  { %1556 = vmatmul.mubr.msk.f32.vlgmr.msra.gmra.mrb[4].mxu1 %vm320_vm8, %v502_v51 }
 0x33f   :  { %1734 = vmatpush3.bf16.msra.mxu1 %v1971_v31 }
 0x340   :  { %v447_v15 = vpop.permute.xlu1 %446  ;;  %1736 = vmatprep.subr.bf16.mxu1 %v1976_v33 }
 0x343   :  { %1738 = vmatpush3.bf16.msra.mxu1 %v1976_v33 }
 0x344   :  { %v466_v52 = vpop.permute.xlu1 %465  ;;  %1740 = vmatprep.subr.bf16.mxu1 %v1987_v36 }
 0x345   :  { %v1828_v49 = vpop.permute.xlu0 %1827 }
 0x346   :  { %v1830_v60 = vunpack.i.h.bf16 %v1828_v49 }
 0x347   :  { %1742 = vmatpush3.bf16.msra.mxu1 %v1987_v36  ;;  %v494_v36 = vsel %vm490_vm14, %v2166_v46, %v447_v15 }
 0x348   :  { %v485_v14 = vpop.permute.xlu1 %484  ;;  %1744 = vmatprep.subr.bf16.mxu1 %v1997_v39  ;;  %v499_v61 = vsel %vm495_vm15, %v494_v36, %v466_v52 }
 0x349   :  { %v445_v54 = vpop.permute.xlu0 %444  ;;  %v504_v0 = vsel %vm500_vm1, %v499_v61, %v485_v14 }
 0x34a   :  { %v493_v33 = vsel %vm490_vm14, %v2148_v29, %v445_v54 }
 0x34b   :  { %1746 = vmatpush3.bf16.msra.mxu1 %v1997_v39  ;;  %v1829_v39 = vunpack.i.l.bf16 %v1828_v49 }
 0x34c   :  { %v1833_v55 = vpop.permute.xlu1 %1832  ;;  %1748 = vmatprep.subr.bf16.mxu1 %v2007_v42 }
 0x34d   :  { %v464_v31 = vpop.permute.xlu0 %463  ;;  %v877_v1 = vsel %vm320_vm8, %v2173_v53, %v1829_v39  ;;  %v1835_v5 = vunpack.i.h.bf16 %v1833_v55  ;;  %v878_v53 = vsel %vm320_vm8, %v2168_v47, %v1830_v60 }
 0x34e   :  { %v498_v56 = vsel %vm495_vm15, %v493_v33, %v464_v31 }
 0x34f   :  { %1750 = vmatpush3.bf16.msra.mxu1 %v2007_v42  ;;  %v1834_v42 = vunpack.i.l.bf16 %v1833_v55  ;;  %v882_v16 = vsel %vm95_vm0, %v878_v53, %v1835_v5 }
 0x350   :  { %1752 = vmatprep.subr.bf16.mxu1 %v2017_v45  ;;  %v1843_v62 = vpop.permute.xlu1 %1842 }
 0x351   :  { %v483_v58 = vpop.permute.xlu0 %482  ;;  %v1844_v3 = vunpack.i.l.bf16 %v1843_v62  ;;  %v881_v4 = vsel %vm95_vm0, %v877_v1, %v1834_v42  ;;  %v1845_v8 = vunpack.i.h.bf16 %v1843_v62 }
 0x352   :  { %v503_v63 = vsel %vm500_vm1, %v498_v56, %v483_v58 }
 0x353   :  { %1754 = vmatpush3.bf16.msra.mxu1 %v2017_v45  ;;  %1558 = vmatprep.mubr.msk.f32.mxu1 %vm320_vm8, %v503_v63  ;;  %v880_v23 = vsel %vm320_vm8, %v2180_v57, %v1845_v8  ;;  %v249_v57 = vld [vmem:[%s2536_s6 + $0x10] sm:$0xff] }
 0x354   :  { %1559 = vmatmul.mubr.msk.f32.gmra.mrb[6].mxu1 %vm320_vm8, %v504_v0  ;;  %1756 = vmatprep.subr.bf16.mxu1 %v2028_v48  ;;  %v1853_v6 = vpop.permute.xlu1 %1852  ;;  %v2284_v30 = vpack.c.bf16 %v250_v28, %v249_v57 }
 0x355   :  { %v1838_v29 = vpop.permute.xlu0 %1837  ;;  %v1854_v13 = vunpack.i.l.bf16 %v1853_v6  ;;  %v1855_v24 = vunpack.i.h.bf16 %v1853_v6 }
 0x356   :  { %v1839_v46 = vunpack.i.l.bf16 %v1838_v29  ;;  %v1840_v9 = vunpack.i.h.bf16 %v1838_v29 }
 0x357   :  { %1758 = vmatpush3.bf16.msra.mxu1 %v2028_v48  ;;  %v879_v48 = vsel %vm320_vm8, %v2188_v2, %v1844_v3  ;;  %v1864_v2 = vmov 0.0|0.0  }
 0x358   :  { %1760 = vmatprep.subr.bf16.mxu1 %v2043_v59  ;;  %v885_v45 = vsel %vm329_vm9, %v881_v4, %v1839_v46  ;;  %v886_v19 = vsel %vm329_vm9, %v882_v16, %v1840_v9  ;;  %1719 = vmatprep.subr.bf16.mxu0 %v1864_v2 }
 0x359   :  { %v1848_v18 = vpop.permute.xlu0 %1847  ;;  %1618 = vmatprep.mubr.f32.mxu1 %v885_v45  ;;  %1721 = vmatpush3.bf16.msra.mxu0 %v2278_v27 }
 0x35a   :  { %v1850_v10 = vunpack.i.h.bf16 %v1848_v18  ;;  %v1849_v11 = vunpack.i.l.bf16 %v1848_v18  ;;  %1722 = vmatprep.subr.bf16.mxu0 %v1864_v2 }
 0x35b   :  { %1762 = vmatpush3.bf16.msra.mxu1 %v2043_v59 }
 0x35c   :  { %v883_v17 = vsel %vm95_vm0, %v879_v48, %v1849_v11  ;;  %v884_v47 = vsel %vm95_vm0, %v880_v23, %v1850_v10 }
 0x35d   :  { %v887_v20 = vsel %vm329_vm9, %v883_v17, %v1854_v13  ;;  %v888_v59 = vsel %vm329_vm9, %v884_v47, %v1855_v24  ;;  %1724 = vmatpush3.bf16.msra.mxu0 %v2284_v30  ;;  %vm805_vm9 = vcmask 1041408  }
 0x35e   :  { %1619 = vmatmul.mubr.f32.vlgmr.msra.gmra.mrb[8].mxu1 %v886_v19  ;;  %1725 = vmatprep.subr.bf16.mxu0 %v1864_v2 }
 0x35f   :  { %1621 = vmatprep.mubr.f32.mxu1 %v887_v20 }
 0x361   :  { %1727 = vmatpush3.bf16.msra.mxu0 %v2294_v35 }
 0x362   :  { %1622 = vmatmul.mubr.f32.gmra.mrb[10].mxu1 %v888_v59  ;;  %1728 = vmatprep.subr.bf16.mxu0 %v1864_v2 }
 0x365   :  { %1730 = vmatpush3.bf16.msra.mxu0 %v2305_v40 }
 0x366   :  { %1764 = vmatprep.subr.bf16.mxu0 %v2123_v12 }
 0x411   :  { %v1557_v43 = vpop.f32.mrb[4].mxu1 }
 0x412   :  { %v595_v44 = vadd.f32 %v1557_v43, %v2310_v41  ;;  %v589_v50 = vpop.f32.mrb[5].mxu1 }
 0x413   :  { %v590_v51 = vadd.f32 %v2310_v41, %v589_v50 }
 0x414   :  { %v2318_v15 = vmax.f32 %v595_v44, 0.0 }
 0x415   :  { %v2320_v52 = vmax.f32 %v590_v51, 0.0 }
 0x416   :  { %v631_v49 = vrot.slane %v2318_v15, 2  ;;  %v616_v14 = vrot.slane %v2318_v15, 1  ;;  %v647_v56 = vrot.slane %v2318_v15, 3 }
 0x417   :  { %v630_v54 = vrot.slane %v2320_v52, 2  ;;  %v615_v55 = vrot.slane %v2320_v52, 1  ;;  %v646_v36 = vrot.slane %v2320_v52, 3 }
 0x419   :  { %v632_v31 = vsel %vm280_vm5, %v630_v54, %v631_v49  ;;  %v617_v33 = vsel %vm260_vm6, %v615_v55, %v616_v14  ;;  %v648_v58 = vsel %vm300_vm7, %v646_v36, %v647_v56 }
 0x41a   :  { %637 = vrot.lane.b32.xlu1 %v632_v31, %s1859_s15  ;;  %620 = vrot.lane.b32.xlu0 %v617_v33, %s1862_s10 }
 0x41e   :  { %653 = vrot.lane.b32.xlu0 %v648_v58, %s1866_s5 }
 0x427   :  { %v1560_v61 = vpop.f32.mrb[6].mxu1 }
 0x428   :  { %v599_v39 = vpop.f32.mrb[7].mxu1  ;;  %v605_v63 = vadd.f32 %v1560_v61, %v2310_v41 }
 0x429   :  { %v600_v62 = vadd.f32 %v2310_v41, %v599_v39 }
 0x42a   :  { %v611_v29 = vmax.f32 %v605_v63, 0.0 }
 0x42b   :  { %v2336_v0 = vmax.f32 %v600_v62, 0.0 }
 0x42c   :  { %v651_v4 = vrot.slane %v611_v29, 3  ;;  %v635_v8 = vrot.slane %v611_v29, 2 }
 0x42d   :  { %v618_v42 = vrot.slane %v2336_v0, 1  ;;  %v633_v46 = vrot.slane %v2336_v0, 2  ;;  %v649_v60 = vrot.slane %v2336_v0, 3 }
 0x42f   :  { %624 = vrot.lane.b32.xlu0 %v618_v42, %s1862_s10  ;;  %v619_v1 = vsel %vm260_vm6, %v616_v14, %v618_v42  ;;  %v634_v45 = vsel %vm280_vm5, %v631_v49, %v633_v46  ;;  %v650_v18 = vsel %vm300_vm7, %v647_v56, %v649_v60  ;;  %v652_v16 = vsel %vm300_vm7, %v649_v60, %v651_v4 }
 0x430   :  { %622 = vrot.lane.b32.xlu1 %v619_v1, %s1862_s10  ;;  %v636_v19 = vsel %vm280_vm5, %v633_v46, %v635_v8 }
 0x431   :  { %v1620_v3 = vpop.f32.mrb[8].mxu1 }
 0x432   :  { %v961_v5 = vadd.f32 %v1620_v3, %v2114_v7  ;;  %v955_v6 = vpop.f32.mrb[9].mxu1 }
 0x433   :  { %v956_v9 = vadd.f32 %v2114_v7, %v955_v6  ;;  %639 = vrot.lane.b32.xlu0 %v634_v45, %s1859_s15 }
 0x434   :  { %v2349_v10 = vmax.f32 %v961_v5, 0.0  ;;  %655 = vrot.lane.b32.xlu1 %v650_v18, %s1866_s5 }
 0x435   :  { %v2352_v11 = vmax.f32 %v956_v9, 0.0  ;;  %v1623_v53 = vpop.f32.mrb[10].mxu1 }
 0x436   :  { %v971_v13 = vadd.f32 %v1623_v53, %v2114_v7  ;;  %v965_v48 = vpop.f32.mrb[11].mxu1  ;;  %v983_v23 = vrot.slane %v2349_v10, 1  ;;  %v1002_v26 = vrot.slane %v2349_v10, 2  ;;  %v1021_v37 = vrot.slane %v2349_v10, 3 }
 0x437   :  { %v966_v17 = vadd.f32 %v2114_v7, %v965_v48  ;;  %657 = vrot.lane.b32.xlu0 %v652_v16, %s1866_s5  ;;  %v982_v20 = vrot.slane %v2352_v11, 1  ;;  %v1001_v7 = vrot.slane %v2352_v11, 2  ;;  %v1020_v34 = vrot.slane %v2352_v11, 3 }
 0x438   :  { %v2361_v47 = vmax.f32 %v971_v13, 0.0  ;;  %641 = vrot.lane.b32.xlu1 %v636_v19, %s1859_s15 }
 0x439   :  { %v2365_v59 = vmax.f32 %v966_v17, 0.0  ;;  %v984_v25 = vsel %vm260_vm6, %v982_v20, %v983_v23  ;;  %v1003_v28 = vsel %vm280_vm5, %v1001_v7, %v1002_v26  ;;  %v1022_v43 = vsel %vm300_vm7, %v1020_v34, %v1021_v37 }
 0x43a   :  { %v987_v24 = vrot.slane %v2361_v47, 1  ;;  %v1006_v57 = vrot.slane %v2361_v47, 2  ;;  %v1025_v55 = vrot.slane %v2361_v47, 3 }
 0x43b   :  { %v985_v32 = vrot.slane %v2365_v59, 1  ;;  %v1004_v44 = vrot.slane %v2365_v59, 2  ;;  %v1023_v49 = vrot.slane %v2365_v59, 3 }
 0x43c   :  { %995 = vrot.lane.b32.xlu0 %v987_v24, %s1861_s4  ;;  %989 = vrot.lane.b32.xlu1 %v984_v25, %s1861_s4 }
 0x43d   :  { %v986_v38 = vsel %vm260_vm6, %v983_v23, %v985_v32  ;;  %v1005_v50 = vsel %vm280_vm5, %v1002_v26, %v1004_v44  ;;  %v988_v51 = vsel %vm260_vm6, %v985_v32, %v987_v24  ;;  %v1024_v14 = vsel %vm300_vm7, %v1021_v37, %v1023_v49 }
 0x43e   :  { %v1007_v54 = vsel %vm280_vm5, %v1004_v44, %v1006_v57  ;;  %v1026_v31 = vsel %vm300_vm7, %v1023_v49, %v1025_v55 }
 0x440   :  { %1014 = vrot.lane.b32.xlu0 %v1006_v57, %s1862_s10  ;;  %1008 = vrot.lane.b32.xlu1 %v1003_v28, %s1862_s10 }
 0x444   :  { %991 = vrot.lane.b32.xlu0 %v986_v38, %s1861_s4  ;;  %1027 = vrot.lane.b32.xlu1 %v1022_v43, %s1863_s11 }
 0x448   :  { %1010 = vrot.lane.b32.xlu0 %v1005_v50, %s1862_s10  ;;  %993 = vrot.lane.b32.xlu1 %v988_v51, %s1861_s4 }
 0x44c   :  { %1029 = vrot.lane.b32.xlu0 %v1024_v14, %s1863_s11  ;;  %1012 = vrot.lane.b32.xlu1 %v1007_v54, %s1862_s10 }
 0x450   :  { %1033 = vrot.lane.b32.xlu0 %v1025_v55, %s1863_s11  ;;  %1031 = vrot.lane.b32.xlu1 %v1026_v31, %s1863_s11 }
 0x48c   :  { %v621_v33 = vpop.permute.xlu0 %620  ;;  %v638_v36 = vpop.permute.xlu1 %637 }
 0x48d   :  { %v662_v56 = vsel %vm495_vm15, %v2320_v52, %v621_v33 }
 0x48e   :  { %v665_v58 = vsel %vm320_vm8, %v662_v56, %v638_v36 }
 0x490   :  { %v654_v61 = vpop.permute.xlu0 %653 }
 0x491   :  { %v669_v39 = vsel %vm668_vm3, %v665_v58, %v654_v61 }
 0x492   :  { %1578 = vmatmul.mubr.msk.f32.vlgmr.msra.gmra.mrb[8].mxu0 %vm95_vm0, %v669_v39 }
 0x493   :  { %1580 = vmatprep.mubr.msk.f32.mxu0 %vm1865_vm2, %v1857_v21  ;;  %1766 = vmatpush3.bf16.msra.mxu0 %v2123_v12 }
 0x494   :  { %1768 = vmatprep.subr.bf16.mxu0 %v2139_v22 }
 0x497   :  { %1770 = vmatpush3.bf16.msra.mxu0 %v2139_v22 }
 0x498   :  { %1771 = vmatprep.subr.bf16.mxu0 %v1864_v2 }
 0x4a1   :  { %v625_v52 = vpop.permute.xlu0 %624 }
 0x4a2   :  { %v623_v62 = vpop.permute.xlu1 %622  ;;  %v664_v22 = vsel %vm495_vm15, %v2336_v0, %v625_v52 }
 0x4a3   :  { %v663_v63 = vsel %vm495_vm15, %v2318_v15, %v623_v62 }
 0x4a5   :  { %v640_v42 = vpop.permute.xlu0 %639 }
 0x4a6   :  { %v666_v29 = vsel %vm320_vm8, %v663_v63, %v640_v42  ;;  %v656_v46 = vpop.permute.xlu1 %655 }
 0x4a7   :  { %v670_v1 = vsel %vm668_vm3, %v666_v29, %v656_v46 }
 0x4a8   :  { %1581 = vmatmul.mubr.msk.f32.gmra.mrb[10].mxu0 %vm95_vm0, %v670_v1 }
 0x4a9   :  { %v658_v12 = vpop.permute.xlu0 %657  ;;  %1583 = vmatprep.mubr.msk.f32.mxu0 %vm1865_vm2, %v1857_v21 }
 0x4aa   :  { %v642_v60 = vpop.permute.xlu1 %641 }
 0x4ab   :  { %v667_v3 = vsel %vm320_vm8, %v664_v22, %v642_v60 }
 0x4ac   :  { %v671_v15 = vsel %vm668_vm3, %v667_v3, %v658_v12 }
 0x4ad   :  { %1584 = vmatmul.mubr.msk.f32.gmra.mrb[12].mxu0 %vm95_vm0, %v671_v15 }
 0x4ae   :  { %v996_v4 = vpop.permute.xlu0 %995  ;;  %v990_v5 = vpop.permute.xlu1 %989 }
 0x4af   :  { %v1039_v8 = vsel %vm490_vm14, %v2352_v11, %v990_v5  ;;  %v1042_v24 = vsel %vm490_vm14, %v2361_v47, %v996_v4 }
 0x4b2   :  { %v1015_v6 = vpop.permute.xlu0 %1014  ;;  %v1009_v45 = vpop.permute.xlu1 %1008 }
 0x4b3   :  { %v1043_v9 = vsel %vm495_vm15, %v1039_v8, %v1009_v45  ;;  %v1046_v26 = vsel %vm495_vm15, %v1042_v24, %v1015_v6 }
 0x4b6   :  { %v992_v18 = vpop.permute.xlu0 %991  ;;  %v1028_v53 = vpop.permute.xlu1 %1027 }
 0x4b7   :  { %v1047_v0 = vsel %vm500_vm1, %v1043_v9, %v1028_v53  ;;  %v1040_v16 = vsel %vm490_vm14, %v2349_v10, %v992_v18 }
 0x4b8   :  { %1632 = vmatprep.mubr.msk.f32.mxu0 %vm320_vm8, %v1047_v0 }
 0x4ba   :  { %v1011_v13 = vpop.permute.xlu0 %1010  ;;  %v994_v48 = vpop.permute.xlu1 %993 }
 0x4bb   :  { %v1044_v17 = vsel %vm495_vm15, %v1040_v16, %v1011_v13  ;;  %v1041_v11 = vsel %vm490_vm14, %v2365_v59, %v994_v48  ;;  %v2452_v59 = vld [vmem:[%s2538_s7] ss:$0 sm:$0xff] }
 0x4be   :  { %v1030_v19 = vpop.permute.xlu0 %1029  ;;  %v1013_v20 = vpop.permute.xlu1 %1012 }
 0x4bf   :  { %v1048_v23 = vsel %vm500_vm1, %v1044_v17, %v1030_v19  ;;  %v1045_v25 = vsel %vm495_vm15, %v1041_v11, %v1013_v20 }
 0x4c0   :  { %1633 = vmatmul.mubr.msk.f32.vlgmr.msra.gmra.mrb[14].mxu0 %vm320_vm8, %v1048_v23 }
 0x4c1   :  { %1773 = vmatpush3.bf16.msra.mxu0 %v2278_v27 }
 0x4c2   :  { %v1034_v7 = vpop.permute.xlu0 %1033  ;;  %v1032_v10 = vpop.permute.xlu1 %1031  ;;  %1774 = vmatprep.subr.bf16.mxu0 %v1864_v2 }
 0x4c3   :  { %v1049_v57 = vsel %vm500_vm1, %v1045_v25, %v1032_v10  ;;  %v1050_v28 = vsel %vm500_vm1, %v1046_v26, %v1034_v7 }
 0x4c4   :  { %1635 = vmatprep.mubr.msk.f32.mxu0 %vm320_vm8, %v1049_v57 }
 0x4c5   :  { %1636 = vmatmul.mubr.msk.f32.gmra.mrb[16].mxu0 %vm320_vm8, %v1050_v28 }
 0x4c6   :  { %1776 = vmatpush3.bf16.msra.mxu0 %v2284_v30  ;;  %1654 = vmatprep.mubr.msk.f32.mxu0 %vm1865_vm2, %v1857_v21 }
 0x4c7   :  { %1777 = vmatprep.subr.bf16.mxu0 %v1864_v2 }
 0x4ca   :  { %1779 = vmatpush3.bf16.msra.mxu0 %v2294_v35 }
 0x4cb   :  { %1780 = vmatprep.subr.bf16.mxu0 %v1864_v2 }
 0x4ce   :  { %1782 = vmatpush3.bf16.msra.mxu0 %v2305_v40 }
 0x565   :  { %v753_v27 = vpop.f32.mrb[8].mxu0 }
 0x566   :  { %v1579_v47 = vpop.f32.mrb[9].mxu0  ;;  %v754_v30 = vadd.f32 %v2452_v59, %v753_v27 }
 0x568   :  { %v767_v32 = vmax.f32 %v754_v30, 0.0 }
 0x56a   :  { %v771_v34 = vrot.slane %v767_v32, 1 }
 0x56c   :  { %v773_v37 = vmax.f32 %v767_v32, %v771_v34 }
 0x56e   :  { %v783_v38 = vrot.slane %v773_v37, 1  ;;  %v785_v44 = vrot.slane %v773_v37, 2  ;;  %v787_v33 = vrot.slane %v773_v37, 3 }
 0x570   :  { %v804_v50 = vsel %vm803_vm4, %v773_v37, %v783_v38 }
 0x571   :  { %v806_v55 = vsel %vm805_vm9, %v804_v50, %v785_v44 }
 0x572   :  { %v808_v61 = vsel %vm807_vm10, %v806_v55, %v787_v33 }
 0x57b   :  { %v758_v43 = vpop.f32.mrb[10].mxu0 }
 0x57c   :  { %v759_v35 = vadd.f32 %v2452_v59, %v758_v43  ;;  %v1582_v2 = vpop.f32.mrb[11].mxu0 }
 0x57e   :  { %v768_v40 = vmax.f32 %v759_v35, 0.0 }
 0x580   :  { %v775_v51 = vrot.slane %v768_v40, 1  ;;  %v763_v49 = vpop.f32.mrb[12].mxu0 }
 0x581   :  { %v764_v14 = vadd.f32 %v2452_v59, %v763_v49  ;;  %v1585_v54 = vpop.f32.mrb[13].mxu0 }
 0x582   :  { %v777_v31 = vmax.f32 %v768_v40, %v775_v51 }
 0x583   :  { %v769_v36 = vmax.f32 %v764_v14, 0.0 }
 0x584   :  { %v790_v56 = vrot.slane %v777_v31, 4  ;;  %v792_v58 = vrot.slane %v777_v31, 5  ;;  %v794_v52 = vrot.slane %v777_v31, 6  ;;  %v796_v63 = vrot.slane %v777_v31, 7 }
 0x585   :  { %v779_v39 = vrot.slane %v769_v36, 1 }
 0x586   :  { %v810_v62 = vsel %vm809_vm11, %v808_v61, %v790_v56 }
 0x587   :  { %v811_v42 = vsel %vm300_vm7, %v810_v62, %v792_v58  ;;  %v781_v29 = vmax.f32 %v769_v36, %v779_v39 }
 0x588   :  { %v812_v46 = vsel %vm280_vm5, %v811_v42, %v794_v52 }
 0x589   :  { %v813_v1 = vsel %vm260_vm6, %v812_v46, %v796_v63  ;;  %v799_v12 = vrot.slane %v781_v29, 1  ;;  %v801_v22 = vrot.slane %v781_v29, 2 }
 0x58a   :  { %1345 = vst.msk [vmem:[%s2539_s8] sm:$0xff] %vm500_vm1, %v813_v1 }
 0x58b   :  { %v814_v60 = vsel %vm803_vm4, %v781_v29, %v799_v12 }
 0x58c   :  { %v815_v3 = vsel %vm805_vm9, %v814_v60, %v801_v22 }
 0x58d   :  { %1347 = vst.msk [vmem:[%s2539_s8 + $0x8] sm:$0x7] %vm1346_vm12, %v815_v3 }
 0x593   :  { %v1634_v15 = vpop.f32.mrb[14].mxu0 }
 0x594   :  { %v1135_v4 = vadd.f32 %v1634_v15, %v2310_v41  ;;  %v1129_v5 = vpop.f32.mrb[15].mxu0 }
 0x595   :  { %v1130_v6 = vadd.f32 %v2310_v41, %v1129_v5 }
 0x596   :  { %v1149_v45 = vmax.f32 %v1135_v4, 0.0 }
 0x597   :  { %v1148_v8 = vmax.f32 %v1130_v6, 0.0 }
 0x598   :  { %v1637_v9 = vpop.f32.mrb[16].mxu0  ;;  %v1171_v18 = vrot.slane %v1149_v45, 2  ;;  %v1156_v53 = vrot.slane %v1149_v45, 1  ;;  %v1187_v23 = vrot.slane %v1149_v45, 3 }
 0x599   :  { %v1139_v0 = vpop.f32.mrb[17].mxu0  ;;  %v1170_v13 = vrot.slane %v1148_v8, 2  ;;  %v1155_v48 = vrot.slane %v1148_v8, 1  ;;  %v1186_v20 = vrot.slane %v1148_v8, 3  ;;  %v1145_v11 = vadd.f32 %v1637_v9, %v2310_v41 }
 0x59a   :  { %v1140_v16 = vadd.f32 %v2310_v41, %v1139_v0 }
 0x59b   :  { %v1172_v17 = vsel %vm280_vm5, %v1170_v13, %v1171_v18  ;;  %v1157_v19 = vsel %vm260_vm6, %v1155_v48, %v1156_v53  ;;  %v1188_v7 = vsel %vm300_vm7, %v1186_v20, %v1187_v23  ;;  %v1151_v26 = vmax.f32 %v1145_v11, 0.0 }
 0x59c   :  { %v1150_v24 = vmax.f32 %v1140_v16, 0.0  ;;  %1177 = vrot.lane.b32.xlu0 %v1172_v17, %s1859_s15  ;;  %1160 = vrot.lane.b32.xlu1 %v1157_v19, %s1862_s10 }
 0x59d   :  { %v1175_v41 = vrot.slane %v1151_v26, 2  ;;  %v1191_v30 = vrot.slane %v1151_v26, 3 }
 0x59e   :  { %v1158_v25 = vrot.slane %v1150_v24, 1  ;;  %v1173_v10 = vrot.slane %v1150_v24, 2  ;;  %v1189_v28 = vrot.slane %v1150_v24, 3 }
 0x5a0   :  { %1193 = vrot.lane.b32.xlu1 %v1188_v7, %s1866_s5  ;;  %v1159_v57 = vsel %vm260_vm6, %v1156_v53, %v1158_v25  ;;  %v1174_v27 = vsel %vm280_vm5, %v1171_v18, %v1173_v10  ;;  %v1190_v47 = vsel %vm300_vm7, %v1187_v23, %v1189_v28  ;;  %v1176_v32 = vsel %vm280_vm5, %v1173_v10, %v1175_v41 }
 0x5a1   :  { %1162 = vrot.lane.b32.xlu0 %v1159_v57, %s1862_s10  ;;  %v1192_v34 = vsel %vm300_vm7, %v1189_v28, %v1191_v30 }
 0x5a4   :  { %1179 = vrot.lane.b32.xlu1 %v1174_v27, %s1859_s15 }
 0x5a5   :  { %1195 = vrot.lane.b32.xlu0 %v1190_v47, %s1866_s5 }
 0x5a8   :  { %1164 = vrot.lane.b32.xlu1 %v1158_v25, %s1862_s10 }
 0x5a9   :  { %1181 = vrot.lane.b32.xlu0 %v1176_v32, %s1859_s15 }
 0x5ac   :  { %1197 = vrot.lane.b32.xlu1 %v1192_v34, %s1866_s5 }
 0x60e   :  { %v1161_v37 = vpop.permute.xlu1 %1160  ;;  %v1178_v38 = vpop.permute.xlu0 %1177 }
 0x60f   :  { %v1202_v43 = vsel %vm495_vm15, %v1148_v8, %v1161_v37 }
 0x610   :  { %v1205_v35 = vsel %vm320_vm8, %v1202_v43, %v1178_v38 }
 0x612   :  { %v1194_v2 = vpop.permute.xlu1 %1193 }
 0x613   :  { %v1208_v44 = vsel %vm668_vm3, %v1205_v35, %v1194_v2  ;;  %v1163_v40 = vpop.permute.xlu0 %1162 }
 0x614   :  { %v1203_v50 = vsel %vm495_vm15, %v1149_v45, %v1163_v40  ;;  %1655 = vmatmul.mubr.msk.f32.vlgmr.msra.gmra.mrb[18].mxu0 %vm95_vm0, %v1208_v44 }
 0x615   :  { %1657 = vmatprep.mubr.msk.f32.mxu0 %vm1865_vm2, %v1857_v21 }
 0x616   :  { %v1180_v51 = vpop.permute.xlu1 %1179 }
 0x617   :  { %v1206_v49 = vsel %vm320_vm8, %v1203_v50, %v1180_v51  ;;  %v1196_v14 = vpop.permute.xlu0 %1195 }
 0x618   :  { %v1209_v54 = vsel %vm668_vm3, %v1206_v49, %v1196_v14 }
 0x619   :  { %1658 = vmatmul.mubr.msk.f32.gmra.mrb[20].mxu0 %vm95_vm0, %v1209_v54 }
 0x61a   :  { %v1165_v55 = vpop.permute.xlu1 %1164  ;;  %1660 = vmatprep.mubr.msk.f32.mxu0 %vm1865_vm2, %v1857_v21 }
 0x61b   :  { %v1204_v31 = vsel %vm495_vm15, %v1150_v24, %v1165_v55  ;;  %v1182_v33 = vpop.permute.xlu0 %1181 }
 0x61c   :  { %v1207_v36 = vsel %vm320_vm8, %v1204_v31, %v1182_v33 }
 0x61e   :  { %v1198_v56 = vpop.permute.xlu1 %1197 }
 0x61f   :  { %v1210_v58 = vsel %vm668_vm3, %v1207_v36, %v1198_v56 }
 0x620   :  { %1661 = vmatmul.mubr.msk.f32.gmra.mrb[22].mxu0 %vm95_vm0, %v1210_v58 }
 0x6e7   :  { %v1286_v61 = vpop.f32.mrb[18].mxu0 }
 0x6e8   :  { %v1287_v39 = vadd.f32 %v2452_v59, %v1286_v61  ;;  %v1656_v52 = vpop.f32.mrb[19].mxu0 }
 0x6ea   :  { %v1300_v62 = vmax.f32 %v1287_v39, 0.0 }
 0x6ec   :  { %v1304_v63 = vrot.slane %v1300_v62, 1  ;;  %v1291_v42 = vpop.f32.mrb[20].mxu0 }
 0x6ed   :  { %v1292_v29 = vadd.f32 %v2452_v59, %v1291_v42  ;;  %v1659_v21 = vpop.f32.mrb[21].mxu0 }
 0x6ee   :  { %v1306_v46 = vmax.f32 %v1300_v62, %v1304_v63 }
 0x6ef   :  { %v1301_v1 = vmax.f32 %v1292_v29, 0.0 }
 0x6f0   :  { %v1316_v12 = vrot.slane %v1306_v46, 1  ;;  %v1318_v22 = vrot.slane %v1306_v46, 2  ;;  %v1320_v6 = vrot.slane %v1306_v46, 3 }
 0x6f1   :  { %v1308_v60 = vrot.slane %v1301_v1, 1 }
 0x6f2   :  { %v1336_v3 = vsel %vm803_vm4, %v1306_v46, %v1316_v12 }
 0x6f3   :  { %v1337_v15 = vsel %vm805_vm9, %v1336_v3, %v1318_v22  ;;  %v1310_v4 = vmax.f32 %v1301_v1, %v1308_v60  ;;  %v1296_v5 = vpop.f32.mrb[22].mxu0 }
 0x6f4   :  { %v1297_v45 = vadd.f32 %v2452_v59, %v1296_v5  ;;  %v1662_v8 = vpop.f32.mrb[23].mxu0  ;;  %v1338_v53 = vsel %vm807_vm10, %v1337_v15, %v1320_v6 }
 0x6f5   :  { %v1323_v9 = vrot.slane %v1310_v4, 4  ;;  %v1325_v18 = vrot.slane %v1310_v4, 5  ;;  %v1327_v13 = vrot.slane %v1310_v4, 6  ;;  %v1329_v16 = vrot.slane %v1310_v4, 7 }
 0x6f6   :  { %v1302_v0 = vmax.f32 %v1297_v45, 0.0 }
 0x6f7   :  { %v1339_v48 = vsel %vm809_vm11, %v1338_v53, %v1323_v9 }
 0x6f8   :  { %v1340_v17 = vsel %vm300_vm7, %v1339_v48, %v1325_v18  ;;  %v1312_v19 = vrot.slane %v1302_v0, 1 }
 0x6f9   :  { %v1341_v20 = vsel %vm280_vm5, %v1340_v17, %v1327_v13 }
 0x6fa   :  { %v1342_v23 = vsel %vm260_vm6, %v1341_v20, %v1329_v16  ;;  %v1314_v11 = vmax.f32 %v1302_v0, %v1312_v19 }
 0x6fb   :  { %1348 = vst.msk [vmem:[%s2539_s8 + $0x10] sm:$0xff] %vm500_vm1, %v1342_v23 }
 0x6fc   :  { %v1332_v59 = vrot.slane %v1314_v11, 1  ;;  %v1334_v24 = vrot.slane %v1314_v11, 2 }
 0x6fe   :  { %v1343_v25 = vsel %vm803_vm4, %v1314_v11, %v1332_v59 }
 0x6ff   :  { %v1344_v7 = vsel %vm805_vm9, %v1343_v25, %v1334_v24 }
 0x700   :  { %1349 = vst.msk [vmem:[%s2539_s8 + $0x18] sm:$0x7] %vm1346_vm12, %v1344_v7 }

</bundles_post_ra>
